<compile_context>
chip_gen: v7x
topology: tpu7x:2x2x1
jax: 0.10.0
libtpu: 0.0.40
codegen_flags: <defaults>
</compile_context>

<pallas_src>
import functools

import jax
import jax.numpy as jnp
from jax.experimental import pallas as pl
from jax.experimental.pallas import tpu as pltpu


def _round_up(x, m):
    return ((x + m - 1) // m) * m


@functools.lru_cache(maxsize=1)
def _vmem_budget_bytes():
    """Conservative scoped-VMEM budget: half of physical VMEM, capped at 40 MiB
    (leaves pipeline headroom on v7x's 64 MiB VMEM; generous on v5e/v6e)."""
    try:
        cap = int(getattr(pltpu.get_tpu_info(), "vmem_capacity_bytes", 64 << 20))
    except Exception:
        cap = 64 << 20
    return int(min(cap // 2, 40 << 20))


# ----------------------------------------------------------------------------- #
# Kernels
# ----------------------------------------------------------------------------- #
def cbow_single_kernel(x_ref, w1_ref, b1_ref, w2_ref, b2_ref, out_ref):
    """Single-pass path: W2/b2 resident in VMEM, whole-row log-softmax.
    x: (TB, D) bf16, w1: (D, H) bf16, b1: (1, H) f32,
    w2: (H, V_pad) bf16, b2: (1, V_pad) f32 (-1e30 on padded cols), out: (TB, V_pad) f32."""
    h = jnp.dot(x_ref[...], w1_ref[...], preferred_element_type=jnp.float32)
    h = jnp.maximum(h + b1_ref[...], 0.0).astype(jnp.bfloat16)
    logits = jnp.dot(h, w2_ref[...],
                     preferred_element_type=jnp.float32) + b2_ref[...]
    m = jnp.max(logits, axis=-1, keepdims=True)
    s = jnp.sum(jnp.exp(logits - m), axis=-1, keepdims=True)
    out_ref[...] = (logits - (m + jnp.log(s))).astype(out_ref.dtype)


def cbow_two_pass_kernel(x_ref, w1_ref, b1_ref, w2_ref, b2_ref, out_ref,
                         h_ref, m_ref, s_ref):
    """Streaming path: W2 tiled over the vocab axis, online log-sum-exp.
    Grid: (batch tiles, 2 passes, vocab tiles).  Pass 0 reduces max/sum-exp into
    (TB,1) f32 scratches; pass 1 recomputes the logits tile and writes log-probs."""
    p = pl.program_id(1)  # 0 = reduction pass, 1 = write pass
    v = pl.program_id(2)  # vocab tile index

    # Hidden layer computed once per batch tile; init online-softmax state.
    @pl.when(jnp.logical_and(p == 0, v == 0))
    def _():
        h = jnp.dot(x_ref[...], w1_ref[...], preferred_element_type=jnp.float32)
        h = jnp.maximum(h + b1_ref[...], 0.0)           # relu in f32
        h_ref[...] = h.astype(h_ref.dtype)              # cached bf16 for 2nd matmul
        m_ref[...] = jnp.full(m_ref.shape, -jnp.inf, dtype=m_ref.dtype)
        s_ref[...] = jnp.zeros(s_ref.shape, dtype=s_ref.dtype)

    # Logits tile in f32 (padded vocab columns carry a -1e30 bias).
    logits = jnp.dot(h_ref[...], w2_ref[...],
                     preferred_element_type=jnp.float32) + b2_ref[...]

    @pl.when(p == 0)
    def _():
        m_prev = m_ref[...]
        m_new = jnp.maximum(m_prev, jnp.max(logits, axis=-1, keepdims=True))
        corr = jnp.exp(m_prev - m_new)
        s_ref[...] = s_ref[...] * corr + jnp.sum(
            jnp.exp(logits - m_new), axis=-1, keepdims=True)
        m_ref[...] = m_new

    @pl.when(p == 1)
    def _():
        lse = m_ref[...] + jnp.log(s_ref[...])
        out_ref[...] = (logits - lse).astype(out_ref.dtype)


# ----------------------------------------------------------------------------- #
# Wrappers
# ----------------------------------------------------------------------------- #
def prepare_cbow_params(w1, b1, w2, b2, *, tv=512):
    """One-time weight cast + pad (hoisted out of the per-call forward, so no extra
    per-call copy of W2 through HBM).  Vocab is padded to a multiple of the
    (256-aligned) vocab tile; padded columns get zero weights and a -1e30 bias."""
    H, V = w2.shape
    TV = min(tv, _round_up(V, 256))          # 256-wide MXU alignment (v6e/v7x)
    V_pad = _round_up(V, TV)
    w1_b = jnp.asarray(w1, jnp.bfloat16)
    b1_r = jnp.asarray(b1, jnp.float32).reshape(1, -1)
    w2_p = jnp.zeros((H, V_pad), jnp.bfloat16).at[:, :V].set(
        jnp.asarray(w2, jnp.bfloat16))
    b2_p = jnp.full((1, V_pad), -1e30, jnp.float32).at[0, :V].set(
        jnp.asarray(b2, jnp.float32))
    return w1_b, b1_r, w2_p, b2_p


@functools.partial(jax.jit,
                   static_argnames=("vocab_size", "tb", "tv", "force_two_pass"))
def cbow_forward(inputs, embedding_table, w1_b, b1_r, w2_p, b2_p, *,
                 vocab_size, tb=256, tv=512, force_two_pass=False):
    """inputs: (B, C) int32 context indices.  Returns (B, vocab_size) f32 log-probs."""
    # Embedding gather + context sum kept in XLA (cheap, irregular access).
    # TODO(synk): fuse the gather via PrefetchScalarGridSpec scalar-prefetch indices.
    x = jnp.sum(jnp.take(embedding_table, inputs, axis=0), axis=1).astype(jnp.bfloat16)

    B, D = x.shape
    H = w1_b.shape[1]
    V_pad = w2_p.shape[1]
    V = vocab_size

    # Batch tile: multiple of 8 sublanes; cap so there are >=2 batch tiles
    # (keeps both TensorCores busy on v7x via the "parallel" batch axis).
    B8 = _round_up(B, 8)
    TB = min(tb, B8)
    if B8 >= 16:
        TB = min(TB, _round_up((B8 + 1) // 2, 8))
    B_pad = _round_up(B8, TB)
    x_p = jnp.zeros((B_pad, D), jnp.bfloat16).at[:B].set(x)

    # Vocab tile (divides V_pad by construction in prepare_cbow_params).
    TV = min(tv, V_pad)

    budget = _vmem_budget_bytes()

    # ---------------- single-pass fast path: W2 resident in VMEM ---------------- #
    bytes_single = (2 * (TB * D * 2 + D * H * 2 + H * 4          # x, W1, b1 (dbuf)
                         + H * V_pad * 2 + V_pad * 4             # W2, b2 (dbuf)
                         + TB * V_pad * 4)                       # out (dbuf)
                    + 4 * TB * V_pad * 4)                        # f32 intermediates
    use_single = (not force_two_pass) and (bytes_single + (2 << 20) <= budget)

    if use_single:
        out = pl.pallas_call(
            cbow_single_kernel,
            out_shape=jax.ShapeDtypeStruct((B_pad, V_pad), jnp.float32),
            grid=(B_pad // TB,),
            in_specs=[
                pl.BlockSpec((TB, D), lambda b: (b, 0)),       # x   (per batch tile)
                pl.BlockSpec((D, H), lambda b: (0, 0)),        # W1  (resident)
                pl.BlockSpec((1, H), lambda b: (0, 0)),        # b1  (resident)
                pl.BlockSpec((H, V_pad), lambda b: (0, 0)),    # W2  (resident)
                pl.BlockSpec((1, V_pad), lambda b: (0, 0)),    # b2  (resident)
            ],
            out_specs=pl.BlockSpec((TB, V_pad), lambda b: (b, 0)),
            compiler_params=pltpu.CompilerParams(
                dimension_semantics=("parallel",),
                vmem_limit_bytes=int(min(max(bytes_single + (2 << 20), 16 << 20),
                                         budget))),
        )(x_p, w1_b, b1_r, w2_p, b2_p)
        return out[:B, :V]

    # -------------- two-pass streaming path: W2 tiled over the vocab ------------ #
    grid = (B_pad // TB, 2, V_pad // TV)
    bytes_two = (2 * (TB * D * 2 + D * H * 2 + H * 4
                      + H * TV * 2 + TV * 4 + TB * TV * 4)       # dbuf blocks
                 + TB * H * 2 + 2 * TB * 4                       # scratch
                 + 4 * TB * TV * 4)                              # f32 intermediates
    vmem_limit = int(min(max(bytes_two + (2 << 20), 16 << 20), budget))

    out = pl.pallas_call(
        cbow_two_pass_kernel,
        out_shape=jax.ShapeDtypeStruct((B_pad, V_pad), jnp.float32),
        grid=grid,
        in_specs=[
            pl.BlockSpec((TB, D), lambda b, p, v: (b, 0)),     # x   (per batch tile)
            pl.BlockSpec((D, H), lambda b, p, v: (0, 0)),      # W1  (resident)
            pl.BlockSpec((1, H), lambda b, p, v: (0, 0)),      # b1  (resident)
            pl.BlockSpec((H, TV), lambda b, p, v: (0, v)),     # W2  (streamed over V)
            pl.BlockSpec((1, TV), lambda b, p, v: (0, v)),     # b2  (streamed over V)
        ],
        # Output block index is independent of v while p==0, so the reduction pass
        # never writes uninitialized blocks back to HBM; each block is written back
        # exactly once, with real data, during pass 1.
        out_specs=pl.BlockSpec((TB, TV), lambda b, p, v: (b, v * p)),
        scratch_shapes=[
            pltpu.VMEM((TB, H), jnp.bfloat16),   # cached hidden activations
            pltpu.VMEM((TB, 1), jnp.float32),    # running max
            pltpu.VMEM((TB, 1), jnp.float32),    # running sum-exp
        ],
        compiler_params=pltpu.CompilerParams(
            dimension_semantics=("parallel", "arbitrary", "arbitrary"),
            vmem_limit_bytes=vmem_limit),
    )(x_p, w1_b, b1_r, w2_p, b2_p)

    return out[:B, :V]


def _reference(inputs, embedding_table, w1, b1, w2, b2):
    """Pure-JAX reference with the same bf16 matmul casts as the kernels."""
    x = jnp.sum(jnp.take(embedding_table, inputs, axis=0), axis=1).astype(jnp.bfloat16)
    h = jnp.maximum(
        jnp.dot(x, w1.astype(jnp.bfloat16), preferred_element_type=jnp.float32)
        + b1.astype(jnp.float32), 0.0).astype(jnp.bfloat16)
    logits = jnp.dot(h, w2.astype(jnp.bfloat16),
                     preferred_element_type=jnp.float32) + b2.astype(jnp.float32)
    return jax.nn.log_softmax(logits, axis=-1)


if __name__ == "__main__":
    # Small but MXU-meaningful synthetic setup: vocab not a multiple of 128
    # (exercises padding + masking), multiple batch tiles, and (for the forced
    # two-pass run) multiple vocab tiles.
    VOCAB = 300       # vocab size (padded to 512 internally with tv=256)
    EMBED = 16        # embedding_dim
    HIDDEN = 128      # hidden layer width
    CONTEXT = 4       # 2 * CONTEXT_SIZE context words
    BATCH = 256       # rows per kernel call

    key = jax.random.PRNGKey(0)
    k_emb, k_w1, k_b1, k_w2, k_b2, k_idx = jax.random.split(key, 6)

    embedding_table = jax.random.normal(k_emb, (VOCAB, EMBED), jnp.float32) * 0.1
    w1 = jax.random.normal(k_w1, (EMBED, HIDDEN), jnp.float32) * 0.1
    b1 = jax.random.normal(k_b1, (HIDDEN,), jnp.float32) * 0.1
    w2 = jax.random.normal(k_w2, (HIDDEN, VOCAB), jnp.float32) * 0.1
    b2 = jax.random.normal(k_b2, (VOCAB,), jnp.float32) * 0.1

    inputs = jax.random.randint(k_idx, (BATCH, CONTEXT), 0, VOCAB, dtype=jnp.int32)

    # One-time weight cast + pad (hoisted out of the per-call forward).
    w1_b, b1_r, w2_p, b2_p = prepare_cbow_params(w1, b1, w2, b2, tv=256)

    ref = _reference(inputs, embedding_table, w1, b1, w2, b2)

    # 1) Single-pass fast path (padded W2 resident in VMEM), grid = (2,) batch tiles.
    lp_single = cbow_forward(inputs, embedding_table, w1_b, b1_r, w2_p, b2_p,
                             vocab_size=VOCAB, tb=256, tv=256)
    lp_single = jax.block_until_ready(lp_single)

    # 2) Streaming two-pass path (large-vocab fallback), grid = (2, 2, 2).
    lp_stream = cbow_forward(inputs, embedding_table, w1_b, b1_r, w2_p, b2_p,
                             vocab_size=VOCAB, tb=256, tv=256, force_two_pass=True)
    lp_stream = jax.block_until_ready(lp_stream)

    for lp in (lp_single, lp_stream):
        assert lp.shape == (BATCH, VOCAB)
        # rows of log_softmax must (almost) sum to 1 after exp
        row_sums = jnp.exp(lp).sum(axis=-1)
        assert bool(jnp.all(jnp.abs(row_sums - 1.0) < 1e-3)), row_sums
        # match the pure-JAX reference (same bf16 matmul casts)
        assert bool(jnp.allclose(lp, ref, atol=1e-3, rtol=1e-3)), (
            float(jnp.max(jnp.abs(lp - ref))))

    print("KERNEL_OK")
</pallas_src>

<mosaic_0001>
module attributes {stable_mosaic.version = 11 : i64} {
  func.func @cbow_single_kernel(%arg0: i32, %arg1: memref<128x16xbf16, #tpu.memory_space<vmem>>, %arg2: memref<16x128xbf16, #tpu.memory_space<vmem>>, %arg3: memref<1x128xf32, #tpu.memory_space<vmem>>, %arg4: memref<128x512xbf16, #tpu.memory_space<vmem>>, %arg5: memref<1x512xf32, #tpu.memory_space<vmem>>, %arg6: memref<128x512xf32, #tpu.memory_space<vmem>>) attributes {dimension_semantics = [#tpu.dimension_semantics<parallel>], iteration_bounds = array<i64: 2>, scalar_prefetch = 0 : i64, scratch_operands = 0 : i64, tpu.core_type = #tpu.core_type<tc>, window_params = [{transform_indices = @transform_0, window_bounds = array<i64: 128, 16>}, {pipeline_mode = #tpu.pipeline_mode<synchronous>, transform_indices = @transform_1, window_bounds = array<i64: 16, 128>}, {pipeline_mode = #tpu.pipeline_mode<synchronous>, transform_indices = @transform_2, window_bounds = array<i64: 1, 128>}, {pipeline_mode = #tpu.pipeline_mode<synchronous>, transform_indices = @transform_3, window_bounds = array<i64: 128, 512>}, {pipeline_mode = #tpu.pipeline_mode<synchronous>, transform_indices = @transform_4, window_bounds = array<i64: 1, 512>}, {transform_indices = @transform_5, window_bounds = array<i64: 128, 512>}]} {
    %c0 = arith.constant 0 : index
    %c0_0 = arith.constant 0 : index
    %0 = vector.load %arg1[%c0, %c0_0] : memref<128x16xbf16, #tpu.memory_space<vmem>>, vector<128x16xbf16>
    %c0_1 = arith.constant 0 : index
    %c0_2 = arith.constant 0 : index
    %1 = vector.load %arg2[%c0_1, %c0_2] : memref<16x128xbf16, #tpu.memory_space<vmem>>, vector<16x128xbf16>
    %cst = arith.constant dense<0.000000e+00> : vector<128x128xf32>
    %2 = tpu.matmul %0, %1, %cst {dimension_numbers = #tpu.dot_dimension_numbers<[1], [0], [0], [1], [0, 0, 1, 1], [], []>} : vector<128x16xbf16>, vector<16x128xbf16>, vector<128x128xf32> -> vector<128x128xf32>
    %c0_3 = arith.constant 0 : index
    %c0_4 = arith.constant 0 : index
    %3 = vector.load %arg3[%c0_3, %c0_4] : memref<1x128xf32, #tpu.memory_space<vmem>>, vector<1x128xf32>
    %4 = vector.broadcast %3 : vector<1x128xf32> to vector<128x128xf32>
    %5 = arith.addf %2, %4 : vector<128x128xf32>
    %cst_5 = arith.constant 0.000000e+00 : f32
    %6 = vector.broadcast %cst_5 : f32 to vector<128x128xf32>
    %7 = arith.maximumf %5, %6 : vector<128x128xf32>
    %8 = arith.truncf %7 : vector<128x128xf32> to vector<128x128xbf16>
    %c0_6 = arith.constant 0 : index
    %c0_7 = arith.constant 0 : index
    %9 = vector.load %arg4[%c0_6, %c0_7] : memref<128x512xbf16, #tpu.memory_space<vmem>>, vector<128x512xbf16>
    %cst_8 = arith.constant dense<0.000000e+00> : vector<128x512xf32>
    %10 = tpu.matmul %8, %9, %cst_8 {dimension_numbers = #tpu.dot_dimension_numbers<[1], [0], [0], [1], [0, 0, 1, 1], [], []>} : vector<128x128xbf16>, vector<128x512xbf16>, vector<128x512xf32> -> vector<128x512xf32>
    %c0_9 = arith.constant 0 : index
    %c0_10 = arith.constant 0 : index
    %11 = vector.load %arg5[%c0_9, %c0_10] : memref<1x512xf32, #tpu.memory_space<vmem>>, vector<1x512xf32>
    %12 = vector.broadcast %11 : vector<1x512xf32> to vector<128x512xf32>
    %13 = arith.addf %10, %12 : vector<128x512xf32>
    %cst_11 = arith.constant dense<0xFF800000> : vector<128xf32>
    %14 = vector.multi_reduction <maximumf>, %13, %cst_11 [1] : vector<128x512xf32> to vector<128xf32>
    %15 = vector.shape_cast %14 : vector<128xf32> to vector<128x1xf32>
    %16 = vector.broadcast %15 : vector<128x1xf32> to vector<128x512xf32>
    %17 = arith.subf %13, %16 : vector<128x512xf32>
    %18 = math.exp %17 : vector<128x512xf32>
    %cst_12 = arith.constant dense<0.000000e+00> : vector<128xf32>
    %19 = vector.multi_reduction <add>, %18, %cst_12 [1] : vector<128x512xf32> to vector<128xf32>
    %20 = vector.shape_cast %19 : vector<128xf32> to vector<128x1xf32>
    %21 = math.log %20 : vector<128x1xf32>
    %22 = arith.addf %15, %21 : vector<128x1xf32>
    %23 = vector.broadcast %22 : vector<128x1xf32> to vector<128x512xf32>
    %24 = arith.subf %13, %23 : vector<128x512xf32>
    %c0_13 = arith.constant 0 : index
    %c0_14 = arith.constant 0 : index
    %25 = vector.load %arg6[%c0_13, %c0_14] : memref<128x512xf32, #tpu.memory_space<vmem>>, vector<128x512xf32>
    tpu.vector_store %arg6[%c0_13, %c0_14], %24 {strides = array<i32>} : memref<128x512xf32, #tpu.memory_space<vmem>>, vector<128x512xf32>,
    return
  }
  func.func @transform_0(%arg0: i32) -> (i32, i32) {
    %c0_i32 = arith.constant 0 : i32
    %c0_i32_0 = arith.constant 0 : i32
    return %arg0, %c0_i32 : i32, i32
  }
  func.func @transform_1(%arg0: i32) -> (i32, i32) {
    %c0_i32 = arith.constant 0 : i32
    %c0_i32_0 = arith.constant 0 : i32
    %c0_i32_1 = arith.constant 0 : i32
    return %c0_i32, %c0_i32_0 : i32, i32
  }
  func.func @transform_2(%arg0: i32) -> (i32, i32) {
    %c0_i32 = arith.constant 0 : i32
    %c0_i32_0 = arith.constant 0 : i32
    %c0_i32_1 = arith.constant 0 : i32
    return %c0_i32, %c0_i32_0 : i32, i32
  }
  func.func @transform_3(%arg0: i32) -> (i32, i32) {
    %c0_i32 = arith.constant 0 : i32
    %c0_i32_0 = arith.constant 0 : i32
    %c0_i32_1 = arith.constant 0 : i32
    return %c0_i32, %c0_i32_0 : i32, i32
  }
  func.func @transform_4(%arg0: i32) -> (i32, i32) {
    %c0_i32 = arith.constant 0 : i32
    %c0_i32_0 = arith.constant 0 : i32
    %c0_i32_1 = arith.constant 0 : i32
    return %c0_i32, %c0_i32_0 : i32, i32
  }
  func.func @transform_5(%arg0: i32) -> (i32, i32) {
    %c0_i32 = arith.constant 0 : i32
    %c0_i32_0 = arith.constant 0 : i32
    return %arg0, %c0_i32 : i32, i32
  }
}

</mosaic_0001>

<bundles_post_ra>
// kernel: cbow_forward.1
= control target key start
LH: loop header
LB: loop body
LE: loop exit
PB: predicated region body
PF: predicated region fallthrough
CT: control target
= control target key end

     0   :  { %s1829_s18 = smov 0   ;;  %s2577_s0 = inlined_call_operand.vmem [shape: bf16[256,16], index: 0, kind: input, shape index: {}]   ;;  %s2578_s1 = inlined_call_operand.vmem [shape: bf16[16,128], index: 1, kind: input, shape index: {}]   ;;  %s2579_s2 = inlined_call_operand.vmem [shape: f32[1,128], index: 2, kind: input, shape index: {}]   ;;  %s2580_s3 = inlined_call_operand.vmem [shape: bf16[128,512], index: 3, kind: input, shape index: {}]   ;;  %s2581_s4 = inlined_call_operand.vmem [shape: f32[1,512], index: 4, kind: input, shape index: {}]   ;;  %s2582_s5 = inlined_call_operand.vmem [shape: f32[256,512], index: 5, kind: output, shape index: {}]  }
   0x1 LB: > { %s1474_s19 = sadd.s32 4294967295, %s1796_s18   ;;  %p1478_p0 = scmp.ge.s32.totalorder %s1796_s18, 1  ;;  %s1796_s18 = sphi %s1829_s18, %s15_s18  }
   0x2   : > { %p188_p1 = scmp.lt.s32.totalorder %s1796_s18, 3 }
   0x4   : > { %p189_p2 = pnand %p1478_p0, %p188_p1 }
   0x6   : > { %192 = sbr.rel (%p189_p2) target bundleno = 849 (0x351), region = 40 }
   0xd   : > { %v1573_v0 = vld [vmem:[%s2578_s1] sm:$0xff]   ;;  %s1479_s22 = sshll.u32 %s1474_s19, 4  ;;  %v1586_v2 = vld [vmem:[%s2580_s3 + $0xc] ss:$16 sps:$4 sm:$0xff]   ;;  %v1584_v5 = vld [vmem:[%s2580_s3 + $0x8] ss:$16 sps:$4 sm:$0xff]  }
   0xe   : > { %p218_p3 = scmp.lt.s32.totalorder %s1479_s22, 31  ;;  %v1582_v1 = vld [vmem:[%s2580_s3 + $0x4] ss:$16 sps:$4 sm:$0xff]   ;;  %1546 = vmatprep.subr.bf16.mxu0 %v1573_v0  ;;  %v1587_v3 = vld [vmem:[%s2580_s3] ss:$16 sps:$4 sm:$0xff]   ;;  %vm302_vm0 = vcmask 130048  }
   0xf   : > { %1547 = vmatpush3.bf16.msra.mxu0 %v1573_v0  ;;  %662 = vmatprep.subr.bf16.mxu1 %v1582_v1  ;;  %v1588_v4 = vld [vmem:[%s2580_s3 + $0x24] ss:$16 sps:$4 sm:$0xff]   ;;  %v1592_v6 = vld [vmem:[%s2580_s3 + $0x2c] ss:$16 sps:$4 sm:$0xff]   ;;  %v1593_v7 = vld [vmem:[%s2580_s3 + $0x20] ss:$16 sps:$4 sm:$0xff]  }
  0x10   : > { %s2739_s22 = smov (!%p218_p3, %s1479_s22), 31  ;;  %775 = vmatprep.subr.bf16.mxu0 %v1586_v2  ;;  %663 = vmatpush1.bf16.msra.mxu1 %v1587_v3  ;;  %v1590_v11 = vld [vmem:[%s2580_s3 + $0x28] ss:$16 sps:$4 sm:$0xff]   ;;  %v1594_v14 = vld [vmem:[%s2580_s3 + $0x44] ss:$16 sps:$4 sm:$0xff]   ;;  %v1798_v41 = vmov 0  }
  0x11   : > { %s1480_s6 = sshll.u32 %s2739_s22, 2  ;;  %664 = vmatprep.subr.bf16.mxu1 %v1588_v4  ;;  %v1596_v15 = vld [vmem:[%s2580_s3 + $0x48] ss:$16 sps:$4 sm:$0xff]   ;;  %v1598_v16 = vld [vmem:[%s2580_s3 + $0x4c] ss:$16 sps:$4 sm:$0xff]   ;;  %694 = vmatprep.mubr.bf16.mxu1 %v1798_v41  ;;  %s1536_s27 = sshll.u32 %s2739_s22, 5 }
  0x12   : > { %s1861_s11 = scalar_lea.vmem %s2577_s0, %s1480_s6  ;;  %v1599_v17 = vld [vmem:[%s2580_s3 + $0x40] ss:$16 sps:$4 sm:$0xff]   ;;  %v1600_v18 = vld [vmem:[%s2580_s3 + $0x64] ss:$16 sps:$4 sm:$0xff]   ;;  %v1602_v19 = vld [vmem:[%s2580_s3 + $0x68] ss:$16 sps:$4 sm:$0xff]   ;;  %s2429_s30 = scalar_lea.vmem %s2582_s5, %s1536_s27 }
  0x13   : > { %v1574_v8 = vld [vmem:[%s1861_s11] sm:$0xff]   ;;  %v1575_v9 = vld [vmem:[%s1861_s11 + $0x8] sm:$0xff]   ;;  %v1576_v10 = vld [vmem:[%s1861_s11 + $0x10] sm:$0xff]  }
  0x14   : > { %1548 = vmatprep.mubr.msk.bf16.mxu0 %vm302_vm0, %v1574_v8  ;;  %665 = vmatpush1.bf16.msra.mxu1 %v1593_v7  ;;  %v1577_v12 = vld [vmem:[%s1861_s11 + $0x18] sm:$0xff]   ;;  %v1578_v13 = vld [vmem:[%s1861_s11 + $0x20] sm:$0xff]   ;;  %v1579_v23 = vld [vmem:[%s1861_s11 + $0x28] sm:$0xff]  }
  0x15   : > { %1549 = vmatmul.mubr.msk.bf16.vlgmr.msra.gmra.mrb[0].mxu0 %vm302_vm0, %v1575_v9  ;;  %666 = vmatprep.subr.bf16.mxu1 %v1594_v14  ;;  %v1604_v20 = vld [vmem:[%s2580_s3 + $0x6c] ss:$16 sps:$4 sm:$0xff]   ;;  %v1605_v21 = vld [vmem:[%s2580_s3 + $0x60] ss:$16 sps:$4 sm:$0xff]   ;;  %v1606_v22 = vld [vmem:[%s2580_s3 + $0x84] ss:$16 sps:$4 sm:$0xff]  }
  0x16   : > { %1552 = vmatprep.mubr.msk.bf16.mxu0 %vm302_vm0, %v1576_v10  ;;  %776 = vmatpush1.bf16.msra.mxu0 %v1584_v5  ;;  %v1610_v24 = vld [vmem:[%s2580_s3 + $0x8c] ss:$16 sps:$4 sm:$0xff]   ;;  %v1580_v25 = vld [vmem:[%s1861_s11 + $0x30] sm:$0xff]   ;;  %v1608_v27 = vld [vmem:[%s2580_s3 + $0x88] ss:$16 sps:$4 sm:$0xff]  }
  0x17   : > { %777 = vmatprep.subr.bf16.mxu0 %v1592_v6  ;;  %v1611_v26 = vld [vmem:[%s2580_s3 + $0x80] ss:$16 sps:$4 sm:$0xff]   ;;  %v1612_v28 = vld [vmem:[%s2580_s3 + $0xa4] ss:$16 sps:$4 sm:$0xff]   ;;  %v1616_v29 = vld [vmem:[%s2580_s3 + $0xac] ss:$16 sps:$4 sm:$0xff]  }
  0x18   : > { %667 = vmatpush1.bf16.msra.mxu1 %v1599_v17  ;;  %v1617_v30 = vld [vmem:[%s2580_s3 + $0xa0] ss:$16 sps:$4 sm:$0xff]   ;;  %v1614_v31 = vld [vmem:[%s2580_s3 + $0xa8] ss:$16 sps:$4 sm:$0xff]   ;;  %v1618_v33 = vld [vmem:[%s2580_s3 + $0xc4] ss:$16 sps:$4 sm:$0xff]  }
  0x19   : > { %668 = vmatprep.subr.bf16.mxu1 %v1600_v18  ;;  %v1581_v32 = vld [vmem:[%s1861_s11 + $0x38] sm:$0xff]   ;;  %v1623_v36 = vld [vmem:[%s2580_s3 + $0xc0] ss:$16 sps:$4 sm:$0xff]   ;;  %v1624_v37 = vld [vmem:[%s2580_s3 + $0xe4] ss:$16 sps:$4 sm:$0xff]  }
  0x1a   : > { %778 = vmatpush1.bf16.msra.mxu0 %v1590_v11  ;;  %v1622_v34 = vld [vmem:[%s2580_s3 + $0xcc] ss:$16 sps:$4 sm:$0xff]   ;;  %v1620_v35 = vld [vmem:[%s2580_s3 + $0xc8] ss:$16 sps:$4 sm:$0xff]   ;;  %v1629_v40 = vld [vmem:[%s2580_s3 + $0xe0] ss:$16 sps:$4 sm:$0xff]  }
  0x1b   : > { %779 = vmatprep.subr.bf16.mxu0 %v1598_v16  ;;  %v1628_v38 = vld [vmem:[%s2580_s3 + $0xec] ss:$16 sps:$4 sm:$0xff]   ;;  %v1626_v39 = vld [vmem:[%s2580_s3 + $0xe8] ss:$16 sps:$4 sm:$0xff]   ;;  %v1965_v42 = vld [vmem:[%s2579_s2] ss:$0 sm:$0xff] }
  0x1c   : > { %669 = vmatpush1.bf16.msra.mxu1 %v1605_v21 }
  0x1d   : > { %1553 = vmatmul.mubr.msk.bf16.gmra.mrb[4].mxu0 %vm302_vm0, %v1577_v12  ;;  %670 = vmatprep.subr.bf16.mxu1 %v1606_v22 }
  0x1e   : > { %1556 = vmatprep.mubr.msk.bf16.mxu0 %vm302_vm0, %v1578_v13  ;;  %780 = vmatpush1.bf16.msra.mxu0 %v1596_v15 }
  0x1f   : > { %781 = vmatprep.subr.bf16.mxu0 %v1604_v20 }
  0x20   : > { %671 = vmatpush1.bf16.msra.mxu1 %v1611_v26 }
  0x21   : > { %672 = vmatprep.subr.bf16.mxu1 %v1612_v28 }
  0x22   : > { %782 = vmatpush1.bf16.msra.mxu0 %v1602_v19 }
  0x23   : > { %783 = vmatprep.subr.bf16.mxu0 %v1610_v24 }
  0x24   : > { %673 = vmatpush1.bf16.msra.mxu1 %v1617_v30 }
  0x25   : > { %1557 = vmatmul.mubr.msk.bf16.gmra.mrb[8].mxu0 %vm302_vm0, %v1579_v23  ;;  %674 = vmatprep.subr.bf16.mxu1 %v1618_v33 }
  0x26   : > { %1560 = vmatprep.mubr.msk.bf16.mxu0 %vm302_vm0, %v1580_v25  ;;  %784 = vmatpush1.bf16.msra.mxu0 %v1608_v27 }
  0x27   : > { %785 = vmatprep.subr.bf16.mxu0 %v1616_v29 }
  0x28   : > { %675 = vmatpush1.bf16.msra.mxu1 %v1623_v36 }
  0x29   : > { %676 = vmatprep.subr.bf16.mxu1 %v1624_v37 }
  0x2a   : > { %786 = vmatpush1.bf16.msra.mxu0 %v1614_v31 }
  0x2b   : > { %787 = vmatprep.subr.bf16.mxu0 %v1622_v34 }
  0x2c   : > { %677 = vmatpush1.bf16.msra.mxu1 %v1629_v40 }
  0x2d   : > { %1561 = vmatmul.mubr.msk.bf16.gmra.mrb[12].mxu0 %vm302_vm0, %v1581_v32 }
  0x2e   : > { %788 = vmatpush1.bf16.msra.mxu0 %v1620_v35  ;;  %807 = vmatprep.mubr.bf16.mxu0 %v1798_v41  ;;  %v482_v35 = vlaneseq }
  0x2f   : > { %789 = vmatprep.subr.bf16.mxu0 %v1628_v38  ;;  %v480_v38 = vld [vmem:[%s2581_s4] sm:$0xf] }
  0x30   : > { %v483_v36 = vshrl.u32 %v482_v35, 7 }
  0x32   : > { %790 = vmatpush1.bf16.msra.mxu0 %v1626_v39  ;;  %v484_v37 = vsub.s32 0, %v483_v36  ;;  %v488_v39 = vsub.s32 1, %v483_v36  ;;  %v492_v40 = vsub.s32 2, %v483_v36 }
  0xe8   : > { %v1550_v43 = vpop.f32.mrb[0].mxu0 }
  0xe9   : > { %v370_v44 = vadd.f32 %v1550_v43, %v1965_v42  ;;  %v361_v45 = vpop.f32.mrb[1].mxu0  ;;  %v2002_v43 = vrot.slane %v480_v38, %v488_v39 }
  0xea   : > { %v362_v46 = vadd.f32 %v1965_v42, %v361_v45  ;;  %v1551_v47 = vpop.f32.mrb[2].mxu0 }
  0xeb   : > { %v373_v48 = vadd.f32 %v1551_v47, %v1965_v42  ;;  %v364_v49 = vpop.f32.mrb[3].mxu0  ;;  %v426_v51 = vmax.f32 %v370_v44, 0.0  ;;  %v496_v44 = vsub.s32 3, %v483_v36 }
  0xec   : > { %v365_v50 = vadd.f32 %v1965_v42, %v364_v49  ;;  %v424_v53 = vmax.f32 %v362_v46, 0.0  ;;  %v2004_v46 = vrot.slane %v480_v38, %v492_v40 }
  0xed   : > { %v427_v52 = vmax.f32 %v373_v48, 0.0 }
  0xee   : > { %v425_v54 = vmax.f32 %v365_v50, 0.0 }
  0xef   : > { %v441_v55 = vpack.c.bf16 %v427_v52, %v426_v51  ;;  %v2012_v51 = vrot.slane %v480_v38, %v496_v44 }
  0xf0   : > { %v440_v56 = vpack.c.bf16 %v425_v54, %v424_v53  ;;  %v1554_v57 = vpop.f32.mrb[4].mxu0 }
  0xf1   : > { %v386_v58 = vadd.f32 %v1554_v57, %v1965_v42  ;;  %v377_v59 = vpop.f32.mrb[5].mxu0 }
  0xf2   : > { %695 = vmatmul.mubr.bf16.vlgmr.msra.gmra.mrb[0].mxu1 %v440_v56  ;;  %808 = vmatmul.mubr.bf16.vlgmr.msra.gmra.mrb[16].mxu0 %v440_v56  ;;  %v378_v60 = vadd.f32 %v1965_v42, %v377_v59  ;;  %v1555_v61 = vpop.f32.mrb[6].mxu0 }
  0xf3   : > { %v430_v62 = vmax.f32 %v386_v58, 0.0  ;;  %v389_v63 = vadd.f32 %v1555_v61, %v1965_v42  ;;  %v380_v0 = vpop.f32.mrb[7].mxu0  ;;  %704 = vmatprep.mubr.bf16.mxu1 %v1798_v41  ;;  %817 = vmatprep.mubr.bf16.mxu0 %v1798_v41 }
  0xf4   : > { %v428_v1 = vmax.f32 %v378_v60, 0.0  ;;  %v381_v2 = vadd.f32 %v1965_v42, %v380_v0 }
  0xf5   : > { %v431_v3 = vmax.f32 %v389_v63, 0.0 }
  0xf6   : > { %v429_v4 = vmax.f32 %v381_v2, 0.0 }
  0xf7   : > { %v443_v5 = vpack.c.bf16 %v431_v3, %v430_v62 }
  0xf8   : > { %v442_v6 = vpack.c.bf16 %v429_v4, %v428_v1  ;;  %v1558_v7 = vpop.f32.mrb[8].mxu0 }
  0xf9   : > { %v402_v8 = vadd.f32 %v1558_v7, %v1965_v42  ;;  %v393_v9 = vpop.f32.mrb[9].mxu0 }
  0xfa   : > { %705 = vmatmul.mubr.bf16.gmra.mrb[4].mxu1 %v441_v55  ;;  %818 = vmatmul.mubr.bf16.gmra.mrb[20].mxu0 %v441_v55  ;;  %v394_v10 = vadd.f32 %v1965_v42, %v393_v9  ;;  %v1559_v11 = vpop.f32.mrb[10].mxu0 }
  0xfb   : > { %714 = vmatprep.mubr.bf16.mxu1 %v1798_v41  ;;  %827 = vmatprep.mubr.bf16.mxu0 %v1798_v41  ;;  %v434_v12 = vmax.f32 %v402_v8, 0.0  ;;  %v405_v13 = vadd.f32 %v1559_v11, %v1965_v42  ;;  %v396_v14 = vpop.f32.mrb[11].mxu0 }
  0xfc   : > { %v432_v15 = vmax.f32 %v394_v10, 0.0  ;;  %v397_v16 = vadd.f32 %v1965_v42, %v396_v14 }
  0xfd   : > { %v435_v17 = vmax.f32 %v405_v13, 0.0 }
  0xfe   : > { %v433_v18 = vmax.f32 %v397_v16, 0.0 }
  0xff   : > { %v445_v19 = vpack.c.bf16 %v435_v17, %v434_v12 }
 0x100   : > { %v444_v20 = vpack.c.bf16 %v433_v18, %v432_v15  ;;  %v1562_v21 = vpop.f32.mrb[12].mxu0 }
 0x101   : > { %v418_v22 = vadd.f32 %v1562_v21, %v1965_v42  ;;  %v409_v23 = vpop.f32.mrb[13].mxu0 }
 0x102   : > { %715 = vmatmul.mubr.bf16.gmra.mrb[8].mxu1 %v442_v6  ;;  %828 = vmatmul.mubr.bf16.gmra.mrb[24].mxu0 %v442_v6  ;;  %v410_v24 = vadd.f32 %v1965_v42, %v409_v23  ;;  %v1563_v25 = vpop.f32.mrb[14].mxu0 }
 0x103   : > { %724 = vmatprep.mubr.bf16.mxu1 %v1798_v41  ;;  %837 = vmatprep.mubr.bf16.mxu0 %v1798_v41  ;;  %v438_v26 = vmax.f32 %v418_v22, 0.0  ;;  %v421_v27 = vadd.f32 %v1563_v25, %v1965_v42  ;;  %v412_v28 = vpop.f32.mrb[15].mxu0 }
 0x104   : > { %v436_v29 = vmax.f32 %v410_v24, 0.0  ;;  %v413_v30 = vadd.f32 %v1965_v42, %v412_v28  ;;  %v2000_v42 = vrot.slane %v480_v38, %v484_v37 }
 0x105   : > { %v439_v31 = vmax.f32 %v421_v27, 0.0 }
 0x106   : > { %v437_v32 = vmax.f32 %v413_v30, 0.0 }
 0x107   : > { %v447_v33 = vpack.c.bf16 %v439_v31, %v438_v26 }
 0x108   : > { %v446_v34 = vpack.c.bf16 %v437_v32, %v436_v29 }
 0x10a   : > { %725 = vmatmul.mubr.bf16.gmra.mrb[12].mxu1 %v443_v5  ;;  %838 = vmatmul.mubr.bf16.gmra.mrb[28].mxu0 %v443_v5 }
 0x10b   : > { %734 = vmatprep.mubr.bf16.mxu1 %v1798_v41  ;;  %847 = vmatprep.mubr.bf16.mxu0 %v1798_v41 }
 0x112   : > { %735 = vmatmul.mubr.bf16.gmra.mrb[16].mxu1 %v444_v20  ;;  %848 = vmatmul.mubr.bf16.gmra.mrb[32].mxu0 %v444_v20 }
 0x113   : > { %744 = vmatprep.mubr.bf16.mxu1 %v1798_v41  ;;  %857 = vmatprep.mubr.bf16.mxu0 %v1798_v41 }
 0x11a   : > { %745 = vmatmul.mubr.bf16.gmra.mrb[20].mxu1 %v445_v19  ;;  %858 = vmatmul.mubr.bf16.gmra.mrb[36].mxu0 %v445_v19 }
 0x11b   : > { %754 = vmatprep.mubr.bf16.mxu1 %v1798_v41  ;;  %867 = vmatprep.mubr.bf16.mxu0 %v1798_v41 }
 0x122   : > { %755 = vmatmul.mubr.bf16.gmra.mrb[24].mxu1 %v446_v34  ;;  %868 = vmatmul.mubr.bf16.gmra.mrb[40].mxu0 %v446_v34 }
 0x123   : > { %764 = vmatprep.mubr.bf16.mxu1 %v1798_v41  ;;  %877 = vmatprep.mubr.bf16.mxu0 %v1798_v41 }
 0x12a   : > { %765 = vmatmul.mubr.bf16.gmra.mrb[28].mxu1 %v447_v33  ;;  %878 = vmatmul.mubr.bf16.gmra.mrb[44].mxu0 %v447_v33 }
 0x1c5   : > { %v696_v45 = vpop.f32.mrb[0].mxu1  ;;  %v809_v41 = vpop.f32.mrb[16].mxu0 }
 0x1c6   : > { %v2007_v47 = vadd.f32 %v696_v45, %v2000_v42  ;;  %v698_v48 = vpop.f32.mrb[1].mxu1  ;;  %v811_v49 = vpop.f32.mrb[17].mxu0  ;;  %v2018_v57 = vadd.f32 %v809_v41, %v2004_v46 }
 0x1c7   : > { %v2010_v50 = vadd.f32 %v698_v48, %v2002_v43  ;;  %v700_v52 = vpop.f32.mrb[2].mxu1  ;;  %v813_v53 = vpop.f32.mrb[18].mxu0  ;;  %v2026_v60 = vadd.f32 %v811_v49, %v2012_v51 }
 0x1c8   : > { %v2015_v54 = vadd.f32 %v700_v52, %v2000_v42  ;;  %v702_v55 = vpop.f32.mrb[3].mxu1  ;;  %v815_v56 = vpop.f32.mrb[19].mxu0  ;;  %v2029_v61 = vadd.f32 %v813_v53, %v2004_v46 }
 0x1c9   : > { %2639 = vst [vmem:[#allocation2_spill] sm:$0xff] %v2010_v50  ;;  %v2021_v58 = vadd.f32 %v702_v55, %v2002_v43  ;;  %v888_v59 = vmax.f32 %v2007_v47, %v2010_v50  ;;  %2642 = vst [vmem:[#allocation5_spill] sm:$0xff] %v2026_v60  ;;  %v2040_v7 = vadd.f32 %v815_v56, %v2012_v51 }
 0x1ca   : > { %2640 = vst [vmem:[#allocation3_spill] sm:$0xff] %v2015_v54 }
 0x1cb   : > { %2641 = vst [vmem:[#allocation4_spill] sm:$0xff] %v2021_v58  ;;  %v893_v62 = vmax.f32 %v2015_v54, %v2021_v58  ;;  %v889_v63 = vmax.f32 %v888_v59, %v2018_v57 }
 0x1cd   : > { %v706_v0 = vpop.f32.mrb[4].mxu1  ;;  %v819_v1 = vpop.f32.mrb[20].mxu0  ;;  %v890_v2 = vmax.f32 %v889_v63, %v2026_v60  ;;  %v894_v3 = vmax.f32 %v893_v62, %v2029_v61 }
 0x1ce   : > { %v2037_v4 = vadd.f32 %v706_v0, %v2000_v42  ;;  %v708_v5 = vpop.f32.mrb[5].mxu1  ;;  %v821_v6 = vpop.f32.mrb[21].mxu0  ;;  %v2049_v14 = vadd.f32 %v819_v1, %v2004_v46 }
 0x1cf   : > { %v2043_v8 = vadd.f32 %v708_v5, %v2002_v43  ;;  %v710_v9 = vpop.f32.mrb[6].mxu1  ;;  %v823_v10 = vpop.f32.mrb[22].mxu0  ;;  %891 = vmax.xlane.f32.xlu0 %v890_v2  ;;  %v895_v16 = vmax.f32 %v894_v3, %v2040_v7  ;;  %v2058_v18 = vadd.f32 %v821_v6, %v2012_v51 }
 0x1d0   : > { %v2046_v11 = vadd.f32 %v710_v9, %v2000_v42  ;;  %v712_v12 = vpop.f32.mrb[7].mxu1  ;;  %v825_v13 = vpop.f32.mrb[23].mxu0  ;;  %2645 = vst [vmem:[#allocation8_spill] sm:$0xff] %v2049_v14  ;;  %v2061_v19 = vadd.f32 %v823_v10, %v2004_v46 }
 0x1d1   : > { %2643 = vst [vmem:[#allocation6_spill] sm:$0xff] %v2043_v8  ;;  %v2052_v15 = vadd.f32 %v712_v12, %v2002_v43  ;;  %v898_v17 = vmax.f32 %v2037_v4, %v2043_v8  ;;  %2647 = vst [vmem:[#allocation10_spill] sm:$0xff] %v2058_v18  ;;  %v2072_v29 = vadd.f32 %v825_v13, %v2012_v51 }
 0x1d2   : > { %2644 = vst [vmem:[#allocation7_spill] sm:$0xff] %v2046_v11  ;;  %2648 = vst [vmem:[#allocation11_spill] sm:$0xff] %v2061_v19 }
 0x1d3   : > { %2646 = vst [vmem:[#allocation9_spill] sm:$0xff] %v2052_v15  ;;  %v903_v20 = vmax.f32 %v2046_v11, %v2052_v15  ;;  %896 = vmax.xlane.f32.xlu0 %v895_v16  ;;  %v899_v21 = vmax.f32 %v898_v17, %v2049_v14  ;;  %2650 = vst [vmem:[#allocation13_spill] sm:$0xff] %v2072_v29 }
 0x1d5   : > { %v716_v22 = vpop.f32.mrb[8].mxu1  ;;  %v829_v23 = vpop.f32.mrb[24].mxu0  ;;  %v900_v24 = vmax.f32 %v899_v21, %v2058_v18  ;;  %v904_v25 = vmax.f32 %v903_v20, %v2061_v19 }
 0x1d6   : > { %v2069_v26 = vadd.f32 %v716_v22, %v2000_v42  ;;  %v718_v27 = vpop.f32.mrb[9].mxu1  ;;  %v831_v28 = vpop.f32.mrb[25].mxu0  ;;  %v2081_v36 = vadd.f32 %v829_v23, %v2004_v46 }
 0x1d7   : > { %v2075_v30 = vadd.f32 %v718_v27, %v2002_v43  ;;  %v720_v31 = vpop.f32.mrb[10].mxu1  ;;  %v833_v32 = vpop.f32.mrb[26].mxu0  ;;  %901 = vmax.xlane.f32.xlu1 %v900_v24  ;;  %v905_v39 = vmax.f32 %v904_v25, %v2072_v29  ;;  %v2090_v40 = vadd.f32 %v831_v28, %v2012_v51 }
 0x1d8   : > { %2649 = vst [vmem:[#allocation12_spill] sm:$0xff] %v2069_v26  ;;  %v2078_v33 = vadd.f32 %v720_v31, %v2000_v42  ;;  %v722_v34 = vpop.f32.mrb[11].mxu1  ;;  %v835_v35 = vpop.f32.mrb[27].mxu0  ;;  %2653 = vst [vmem:[#allocation16_spill] sm:$0xff] %v2081_v36  ;;  %v2093_v44 = vadd.f32 %v833_v32, %v2004_v46 }
 0x1d9   : > { %2651 = vst [vmem:[#allocation14_spill] sm:$0xff] %v2075_v30  ;;  %v908_v37 = vmax.f32 %v2069_v26, %v2075_v30  ;;  %v2086_v38 = vadd.f32 %v722_v34, %v2002_v43  ;;  %2655 = vst [vmem:[#allocation18_spill] sm:$0xff] %v2090_v40  ;;  %v2099_v48 = vadd.f32 %v835_v35, %v2012_v51 }
 0x1da   : > { %2652 = vst [vmem:[#allocation15_spill] sm:$0xff] %v2078_v33  ;;  %2656 = vst [vmem:[#allocation19_spill] sm:$0xff] %v2093_v44 }
 0x1db   : > { %2654 = vst [vmem:[#allocation17_spill] sm:$0xff] %v2086_v38  ;;  %v913_v45 = vmax.f32 %v2078_v33, %v2086_v38  ;;  %906 = vmax.xlane.f32.xlu1 %v905_v39  ;;  %v909_v41 = vmax.f32 %v908_v37, %v2081_v36 }
 0x1dd   : > { %v726_v49 = vpop.f32.mrb[12].mxu1  ;;  %v839_v52 = vpop.f32.mrb[28].mxu0  ;;  %v910_v53 = vmax.f32 %v909_v41, %v2090_v40  ;;  %v914_v55 = vmax.f32 %v913_v45, %v2093_v44 }
 0x1de   : > { %v2104_v56 = vadd.f32 %v726_v49, %v2000_v42  ;;  %v728_v59 = vpop.f32.mrb[13].mxu1  ;;  %v841_v62 = vpop.f32.mrb[29].mxu0  ;;  %v2114_v9 = vadd.f32 %v839_v52, %v2004_v46 }
 0x1df   : > { %v2107_v63 = vadd.f32 %v728_v59, %v2002_v43  ;;  %v730_v0 = vpop.f32.mrb[14].mxu1  ;;  %v843_v1 = vpop.f32.mrb[30].mxu0  ;;  %911 = vmax.xlane.f32.xlu0 %v910_v53  ;;  %v915_v2 = vmax.f32 %v914_v55, %v2099_v48  ;;  %v2122_v13 = vadd.f32 %v841_v62, %v2012_v51 }
 0x1e0   : > { %v2111_v3 = vadd.f32 %v730_v0, %v2000_v42  ;;  %v732_v5 = vpop.f32.mrb[15].mxu1  ;;  %v845_v6 = vpop.f32.mrb[31].mxu0  ;;  %v2125_v16 = vadd.f32 %v843_v1, %v2004_v46 }
 0x1e1   : > { %v918_v10 = vmax.f32 %v2104_v56, %v2107_v63  ;;  %v2119_v12 = vadd.f32 %v732_v5, %v2002_v43  ;;  %916 = vmax.xlane.f32.xlu1 %v915_v2  ;;  %v2131_v21 = vadd.f32 %v845_v6, %v2012_v51 }
 0x1e2   : > { %2658 = vst [vmem:[#allocation21_spill] sm:$0xff] %v2125_v16 }
 0x1e3   : > { %2657 = vst [vmem:[#allocation20_spill] sm:$0xff] %v2119_v12  ;;  %v923_v17 = vmax.f32 %v2111_v3, %v2119_v12  ;;  %v919_v20 = vmax.f32 %v918_v10, %v2114_v9 }
 0x1e5   : > { %v736_v22 = vpop.f32.mrb[16].mxu1  ;;  %v849_v23 = vpop.f32.mrb[32].mxu0  ;;  %v920_v24 = vmax.f32 %v919_v20, %v2122_v13  ;;  %v924_v25 = vmax.f32 %v923_v17, %v2125_v16 }
 0x1e6   : > { %v2136_v27 = vadd.f32 %v736_v22, %v2000_v42  ;;  %v738_v28 = vpop.f32.mrb[17].mxu1  ;;  %v851_v31 = vpop.f32.mrb[33].mxu0  ;;  %v2146_v49 = vadd.f32 %v849_v23, %v2004_v46 }
 0x1e7   : > { %v2139_v32 = vadd.f32 %v738_v28, %v2002_v43  ;;  %v740_v34 = vpop.f32.mrb[18].mxu1  ;;  %v853_v35 = vpop.f32.mrb[34].mxu0  ;;  %921 = vmax.xlane.f32.xlu0 %v920_v24  ;;  %v925_v37 = vmax.f32 %v924_v25, %v2131_v21  ;;  %v2154_v55 = vadd.f32 %v851_v31, %v2012_v51 }
 0x1e8   : > { %v2143_v39 = vadd.f32 %v740_v34, %v2000_v42  ;;  %v742_v45 = vpop.f32.mrb[19].mxu1  ;;  %v855_v41 = vpop.f32.mrb[35].mxu0  ;;  %v2157_v59 = vadd.f32 %v853_v35, %v2004_v46 }
 0x1e9   : > { %v928_v52 = vmax.f32 %v2136_v27, %v2139_v32  ;;  %v2151_v53 = vadd.f32 %v742_v45, %v2002_v43  ;;  %926 = vmax.xlane.f32.xlu1 %v925_v37  ;;  %v2163_v1 = vadd.f32 %v855_v41, %v2012_v51 }
 0x1ea   : > { %2660 = vst [vmem:[#allocation23_spill] sm:$0xff] %v2157_v59 }
 0x1eb   : > { %2659 = vst [vmem:[#allocation22_spill] sm:$0xff] %v2151_v53  ;;  %v933_v62 = vmax.f32 %v2143_v39, %v2151_v53  ;;  %v929_v0 = vmax.f32 %v928_v52, %v2146_v49 }
 0x1ed   : > { %v746_v2 = vpop.f32.mrb[20].mxu1  ;;  %v859_v5 = vpop.f32.mrb[36].mxu0  ;;  %v930_v6 = vmax.f32 %v929_v0, %v2154_v55  ;;  %v934_v10 = vmax.f32 %v933_v62, %v2157_v59 }
 0x1ee   : > { %v2168_v17 = vadd.f32 %v746_v2, %v2000_v42  ;;  %v748_v20 = vpop.f32.mrb[21].mxu1  ;;  %v861_v22 = vpop.f32.mrb[37].mxu0  ;;  %v2178_v37 = vadd.f32 %v859_v5, %v2004_v46 }
 0x1ef   : > { %v2171_v23 = vadd.f32 %v748_v20, %v2002_v43  ;;  %v750_v24 = vpop.f32.mrb[22].mxu1  ;;  %v863_v25 = vpop.f32.mrb[38].mxu0  ;;  %931 = vmax.xlane.f32.xlu0 %v930_v6  ;;  %v935_v28 = vmax.f32 %v934_v10, %v2163_v1  ;;  %v2186_v52 = vadd.f32 %v861_v22, %v2012_v51 }
 0x1f0   : > { %2661 = vst [vmem:[#allocation24_spill] sm:$0xff] %v2168_v17  ;;  %v2175_v31 = vadd.f32 %v750_v24, %v2000_v42  ;;  %v752_v34 = vpop.f32.mrb[23].mxu1  ;;  %v865_v35 = vpop.f32.mrb[39].mxu0  ;;  %2664 = vst [vmem:[#allocation27_spill] sm:$0xff] %v2178_v37  ;;  %v2189_v62 = vadd.f32 %v863_v25, %v2004_v46 }
 0x1f1   : > { %2662 = vst [vmem:[#allocation25_spill] sm:$0xff] %v2171_v23  ;;  %v938_v45 = vmax.f32 %v2168_v17, %v2171_v23  ;;  %v2183_v41 = vadd.f32 %v752_v34, %v2002_v43  ;;  %936 = vmax.xlane.f32.xlu1 %v935_v28  ;;  %2666 = vst [vmem:[#allocation29_spill] sm:$0xff] %v2186_v52  ;;  %v2195_v5 = vadd.f32 %v865_v35, %v2012_v51 }
 0x1f2   : > { %2663 = vst [vmem:[#allocation26_spill] sm:$0xff] %v2175_v31  ;;  %2667 = vst [vmem:[#allocation30_spill] sm:$0xff] %v2189_v62 }
 0x1f3   : > { %2665 = vst [vmem:[#allocation28_spill] sm:$0xff] %v2183_v41  ;;  %v943_v0 = vmax.f32 %v2175_v31, %v2183_v41  ;;  %v939_v2 = vmax.f32 %v938_v45, %v2178_v37  ;;  %2668 = vst [vmem:[#allocation31_spill] sm:$0xff] %v2195_v5 }
 0x1f5   : > { %v756_v6 = vpop.f32.mrb[24].mxu1  ;;  %v869_v10 = vpop.f32.mrb[40].mxu0  ;;  %v940_v20 = vmax.f32 %v939_v2, %v2186_v52  ;;  %v944_v24 = vmax.f32 %v943_v0, %v2189_v62 }
 0x1f6   : > { %v2200_v22 = vadd.f32 %v756_v6, %v2000_v42  ;;  %v758_v28 = vpop.f32.mrb[25].mxu1  ;;  %v871_v25 = vpop.f32.mrb[41].mxu0  ;;  %v2210_v0 = vadd.f32 %v869_v10, %v2004_v46 }
 0x1f7   : > { %v2203_v34 = vadd.f32 %v758_v28, %v2002_v43  ;;  %v760_v41 = vpop.f32.mrb[26].mxu1  ;;  %v873_v31 = vpop.f32.mrb[42].mxu0  ;;  %941 = vmax.xlane.f32.xlu0 %v940_v20  ;;  %v945_v35 = vmax.f32 %v944_v24, %v2195_v5  ;;  %v2218_v28 = vadd.f32 %v871_v25, %v2012_v51 }
 0x1f8   : > { %2669 = vst [vmem:[#allocation32_spill] sm:$0xff] %v2200_v22  ;;  %v2207_v45 = vadd.f32 %v760_v41, %v2000_v42  ;;  %v762_v37 = vpop.f32.mrb[27].mxu1  ;;  %v875_v2 = vpop.f32.mrb[43].mxu0  ;;  %2672 = vst [vmem:[#allocation35_spill] sm:$0xff] %v2210_v0  ;;  %v2221_v20 = vadd.f32 %v873_v31, %v2004_v46 }
 0x1f9   : > { %2670 = vst [vmem:[#allocation33_spill] sm:$0xff] %v2203_v34  ;;  %v948_v6 = vmax.f32 %v2200_v22, %v2203_v34  ;;  %v2215_v62 = vadd.f32 %v762_v37, %v2002_v43  ;;  %946 = vmax.xlane.f32.xlu1 %v945_v35  ;;  %2674 = vst [vmem:[#allocation37_spill] sm:$0xff] %v2218_v28  ;;  %v2227_v10 = vadd.f32 %v875_v2, %v2012_v51 }
 0x1fa   : > { %2671 = vst [vmem:[#allocation34_spill] sm:$0xff] %v2207_v45  ;;  %2675 = vst [vmem:[#allocation38_spill] sm:$0xff] %v2221_v20 }
 0x1fb   : > { %2673 = vst [vmem:[#allocation36_spill] sm:$0xff] %v2215_v62  ;;  %v953_v41 = vmax.f32 %v2207_v45, %v2215_v62  ;;  %v949_v24 = vmax.f32 %v948_v6, %v2210_v0 }
 0x1fd   : > { %v766_v5 = vpop.f32.mrb[28].mxu1  ;;  %v879_v34 = vpop.f32.mrb[44].mxu0  ;;  %v950_v37 = vmax.f32 %v949_v24, %v2218_v28  ;;  %v954_v35 = vmax.f32 %v953_v41, %v2221_v20 }
 0x1fe   : > { %v2232_v25 = vadd.f32 %v766_v5, %v2000_v42  ;;  %v768_v22 = vpop.f32.mrb[29].mxu1  ;;  %v881_v31 = vpop.f32.mrb[45].mxu0  ;;  %v2242_v41 = vadd.f32 %v879_v34, %v2004_v46 }
 0x1ff   : > { %v2235_v52 = vadd.f32 %v768_v22, %v2002_v43  ;;  %v770_v62 = vpop.f32.mrb[30].mxu1  ;;  %v883_v45 = vpop.f32.mrb[46].mxu0  ;;  %951 = vmax.xlane.f32.xlu0 %v950_v37  ;;  %v955_v2 = vmax.f32 %v954_v35, %v2227_v10  ;;  %v2250_v22 = vadd.f32 %v881_v31, %v2012_v51 }
 0x200   : > { %v2239_v6 = vadd.f32 %v770_v62, %v2000_v42  ;;  %v772_v0 = vpop.f32.mrb[31].mxu1  ;;  %v885_v24 = vpop.f32.mrb[47].mxu0  ;;  %v2253_v37 = vadd.f32 %v883_v45, %v2004_v46 }
 0x201   : > { %v958_v5 = vmax.f32 %v2232_v25, %v2235_v52  ;;  %v2247_v20 = vadd.f32 %v772_v0, %v2002_v43  ;;  %956 = vmax.xlane.f32.xlu1 %v955_v2  ;;  %v2259_v34 = vadd.f32 %v885_v24, %v2012_v51 }
 0x202   : > { %2677 = vst [vmem:[#allocation40_spill] sm:$0xff] %v2253_v37 }
 0x203   : > { %2676 = vst [vmem:[#allocation39_spill] sm:$0xff] %v2247_v20  ;;  %v963_v42 = vmax.f32 %v2239_v6, %v2247_v20  ;;  %v959_v62 = vmax.f32 %v958_v5, %v2242_v41  ;;  %2678 = vst [vmem:[#allocation41_spill] sm:$0xff] %v2259_v34 }
 0x205   : > { %v960_v35 = vmax.f32 %v959_v62, %v2250_v22  ;;  %v964_v43 = vmax.f32 %v963_v42, %v2253_v37 }
 0x207   : > { %961 = vmax.xlane.f32.xlu0 %v960_v35  ;;  %v965_v0 = vmax.f32 %v964_v43, %v2259_v34 }
 0x209   : > { %966 = vmax.xlane.f32.xlu1 %v965_v0 }
 0x25c   : > { %v2264_v31 = vpop.xlane.xlu0 %891 }
 0x25d   : > { %v968_v46 = vsub.f32 %v2007_v47, %v2264_v31  ;;  %v969_v45 = vsub.f32 %v2010_v50, %v2264_v31  ;;  %v970_v51 = vsub.f32 %v2018_v57, %v2264_v31  ;;  %v971_v2 = vsub.f32 %v2026_v60, %v2264_v31 }
 0x25f   : > { %v1032_v24 = vmul.f32 1.442695, %v968_v46  ;;  %v1034_v5 = vmul.f32 1.442695, %v969_v45  ;;  %v1036_v42 = vmul.f32 1.442695, %v970_v51 }
 0x260   : > { %v1038_v62 = vmul.f32 1.442695, %v971_v2  ;;  %v2274_v35 = vpop.xlane.xlu0 %896 }
 0x261   : > { %1630 = vpow2.f32 %v1032_v24  ;;  %v972_v43 = vsub.f32 %v2015_v54, %v2274_v35  ;;  %v973_v0 = vsub.f32 %v2021_v58, %v2274_v35  ;;  %v974_v50 = vsub.f32 %v2029_v61, %v2274_v35 }
 0x262   : > { %1632 = vpow2.f32 %v1034_v5  ;;  %v975_v60 = vsub.f32 %v2040_v7, %v2274_v35 }
 0x263   : > { %1634 = vpow2.f32 %v1036_v42  ;;  %v1040_v46 = vmul.f32 1.442695, %v972_v43  ;;  %v1042_v45 = vmul.f32 1.442695, %v973_v0  ;;  %v1044_v51 = vmul.f32 1.442695, %v974_v50 }
 0x264   : > { %1636 = vpow2.f32 %v1038_v62  ;;  %v1046_v2 = vmul.f32 1.442695, %v975_v60  ;;  %v2284_v24 = vpop.xlane.xlu1 %901 }
 0x265   : > { %1638 = vpow2.f32 %v1040_v46  ;;  %v976_v54 = vsub.f32 %v2037_v4, %v2284_v24  ;;  %v977_v58 = vsub.f32 %v2043_v8, %v2284_v24  ;;  %v978_v5 = vsub.f32 %v2049_v14, %v2284_v24 }
 0x266   : > { %1640 = vpow2.f32 %v1042_v45  ;;  %v979_v42 = vsub.f32 %v2058_v18, %v2284_v24 }
 0x267   : > { %1642 = vpow2.f32 %v1044_v51  ;;  %v1048_v50 = vmul.f32 1.442695, %v976_v54  ;;  %v1050_v62 = vmul.f32 1.442695, %v977_v58  ;;  %v1052_v60 = vmul.f32 1.442695, %v978_v5 }
 0x268   : > { %1644 = vpow2.f32 %v1046_v2  ;;  %v1054_v43 = vmul.f32 1.442695, %v979_v42  ;;  %v2294_v0 = vpop.xlane.xlu1 %906 }
 0x269   : > { %2679 = vst [vmem:[#allocation42_spill] sm:$0xff] %v2294_v0  ;;  %1646 = vpow2.f32 %v1048_v50  ;;  %v980_v46 = vsub.f32 %v2046_v11, %v2294_v0  ;;  %v981_v8 = vsub.f32 %v2052_v15, %v2294_v0  ;;  %v982_v45 = vsub.f32 %v2061_v19, %v2294_v0 }
 0x26a   : > { %1648 = vpow2.f32 %v1050_v62  ;;  %v983_v54 = vsub.f32 %v2072_v29, %v2294_v0 }
 0x26b   : > { %v1631_v58 = vpop.eup %1630  ;;  %1650 = vpow2.f32 %v1052_v60  ;;  %v1056_v51 = vmul.f32 1.442695, %v980_v46  ;;  %v1058_v2 = vmul.f32 1.442695, %v981_v8  ;;  %v1060_v5 = vmul.f32 1.442695, %v982_v45 }
 0x26c   : > { %v1633_v42 = vpop.eup %1632  ;;  %1652 = vpow2.f32 %v1054_v43  ;;  %v1062_v50 = vmul.f32 1.442695, %v983_v54  ;;  %v2304_v18 = vpop.xlane.xlu0 %911 }
 0x26d   : > { %2680 = vst [vmem:[#allocation43_spill] sm:$0xff] %v2304_v18  ;;  %v1635_v11 = vpop.eup %1634  ;;  %1654 = vpow2.f32 %v1056_v51  ;;  %v984_v15 = vsub.f32 %v2069_v26, %v2304_v18  ;;  %v985_v62 = vsub.f32 %v2075_v30, %v2304_v18  ;;  %v986_v29 = vsub.f32 %v2081_v36, %v2304_v18 }
 0x26e   : > { %v1637_v60 = vpop.eup %1636  ;;  %1656 = vpow2.f32 %v1058_v2  ;;  %v987_v8 = vsub.f32 %v2090_v40, %v2304_v18  ;;  %v2314_v43 = vpop.xlane.xlu1 %916  ;;  %v1160_v46 = vadd.f32 %v1633_v42, %v1631_v58 }
 0x26f   : > { %v1639_v45 = vpop.eup %1638  ;;  %1658 = vpow2.f32 %v1060_v5  ;;  %v1064_v54 = vmul.f32 1.442695, %v984_v15  ;;  %v1066_v51 = vmul.f32 1.442695, %v985_v62  ;;  %v1068_v19 = vmul.f32 1.442695, %v986_v29 }
 0x270   : > { %v1641_v26 = vpop.eup %1640  ;;  %1660 = vpow2.f32 %v1062_v50  ;;  %v1070_v0 = vmul.f32 1.442695, %v987_v8  ;;  %v988_v30 = vsub.f32 %v2078_v33, %v2314_v43  ;;  %v989_v2 = vsub.f32 %v2086_v38, %v2314_v43 }
 0x271   : > { %v1643_v36 = vpop.eup %1642  ;;  %1662 = vpow2.f32 %v1064_v54  ;;  %v990_v40 = vsub.f32 %v2093_v44, %v2314_v43  ;;  %v991_v58 = vsub.f32 %v2099_v48, %v2314_v43  ;;  %v1161_v15 = vadd.f32 %v1635_v11, %v1160_v46 }
 0x272   : > { %v1645_v5 = vpop.eup %1644  ;;  %1664 = vpow2.f32 %v1066_v51  ;;  %v1072_v29 = vmul.f32 1.442695, %v988_v30  ;;  %v1074_v42 = vmul.f32 1.442695, %v989_v2  ;;  %v1165_v50 = vadd.f32 %v1641_v26, %v1639_v45 }
 0x273   : > { %v1647_v62 = vpop.eup %1646  ;;  %1666 = vpow2.f32 %v1068_v19  ;;  %v1076_v8 = vmul.f32 1.442695, %v990_v40  ;;  %v1162_v33 = vadd.f32 %v1637_v60, %v1161_v15  ;;  %v1078_v38 = vmul.f32 1.442695, %v991_v58 }
 0x274   : > { %v1649_v18 = vpop.eup %1648  ;;  %1668 = vpow2.f32 %v1070_v0  ;;  %v2324_v54 = vpop.xlane.xlu0 %921  ;;  %v1166_v14 = vadd.f32 %v1643_v36, %v1165_v50 }
 0x275   : > { %v1651_v44 = vpop.eup %1650  ;;  %1670 = vpow2.f32 %v1072_v29  ;;  %1163 = vadd.xlane.f32.xlu0 %v1162_v33  ;;  %v992_v11 = vsub.f32 %v2104_v56, %v2324_v54  ;;  %v993_v30 = vsub.f32 %v2107_v63, %v2324_v54  ;;  %v994_v19 = vsub.f32 %v2114_v9, %v2324_v54 }
 0x276   : > { %v1653_v26 = vpop.eup %1652  ;;  %1672 = vpow2.f32 %v1074_v42  ;;  %v995_v40 = vsub.f32 %v2122_v13, %v2324_v54  ;;  %v2334_v0 = vpop.xlane.xlu1 %926  ;;  %v1167_v36 = vadd.f32 %v1645_v5, %v1166_v14  ;;  %v1170_v60 = vadd.f32 %v1649_v18, %v1647_v62 }
 0x277   : > { %v1655_v46 = vpop.eup %1654  ;;  %1674 = vpow2.f32 %v1076_v8  ;;  %v1080_v33 = vmul.f32 1.442695, %v992_v11  ;;  %v1082_v45 = vmul.f32 1.442695, %v993_v30  ;;  %v1084_v51 = vmul.f32 1.442695, %v994_v19 }
 0x278   : > { %v1657_v2 = vpop.eup %1656  ;;  %1676 = vpow2.f32 %v1078_v38  ;;  %v1086_v58 = vmul.f32 1.442695, %v995_v40  ;;  %v996_v15 = vsub.f32 %v2111_v3, %v2334_v0  ;;  %v997_v29 = vsub.f32 %v2119_v12, %v2334_v0  ;;  %1168 = vadd.xlane.f32.xlu1 %v1167_v36 }
 0x279   : > { %v1659_v42 = vpop.eup %1658  ;;  %1678 = vpow2.f32 %v1080_v33  ;;  %v998_v14 = vsub.f32 %v2125_v16, %v2334_v0  ;;  %v999_v18 = vsub.f32 %v2131_v21, %v2334_v0  ;;  %v1171_v5 = vadd.f32 %v1651_v44, %v1170_v60 }
 0x27a   : > { %v1661_v50 = vpop.eup %1660  ;;  %1680 = vpow2.f32 %v1082_v45  ;;  %v1088_v38 = vmul.f32 1.442695, %v996_v15  ;;  %v1090_v62 = vmul.f32 1.442695, %v997_v29  ;;  %v1175_v8 = vadd.f32 %v1657_v2, %v1655_v46 }
 0x27b   : > { %v1663_v11 = vpop.eup %1662  ;;  %1682 = vpow2.f32 %v1084_v51  ;;  %v1092_v30 = vmul.f32 1.442695, %v998_v14  ;;  %v1172_v19 = vadd.f32 %v1653_v26, %v1171_v5  ;;  %v1094_v36 = vmul.f32 1.442695, %v999_v18 }
 0x27c   : > { %v1665_v40 = vpop.eup %1664  ;;  %1684 = vpow2.f32 %v1086_v58  ;;  %v2344_v33 = vpop.xlane.xlu0 %931  ;;  %v1176_v12 = vadd.f32 %v1659_v42, %v1175_v8 }
 0x27d   : > { %v1667_v16 = vpop.eup %1666  ;;  %1686 = vpow2.f32 %v1088_v38  ;;  %1173 = vadd.xlane.f32.xlu0 %v1172_v19  ;;  %v1000_v44 = vsub.f32 %v2136_v27, %v2344_v33  ;;  %v1001_v60 = vsub.f32 %v2139_v32, %v2344_v33  ;;  %v1002_v46 = vsub.f32 %v2146_v49, %v2344_v33 }
 0x27e   : > { %v1669_v45 = vpop.eup %1668  ;;  %1688 = vpow2.f32 %v1090_v62  ;;  %v1003_v26 = vsub.f32 %v2154_v55, %v2344_v33  ;;  %v2354_v51 = vpop.xlane.xlu1 %936  ;;  %v1177_v2 = vadd.f32 %v1661_v50, %v1176_v12  ;;  %v1180_v58 = vadd.f32 %v1665_v40, %v1663_v11 }
 0x27f   : > { %v1671_v15 = vpop.eup %1670  ;;  %1690 = vpow2.f32 %v1092_v30  ;;  %v1096_v29 = vmul.f32 1.442695, %v1000_v44  ;;  %v1098_v42 = vmul.f32 1.442695, %v1001_v60  ;;  %v1100_v14 = vmul.f32 1.442695, %v1002_v46 }
 0x280   : > { %v1673_v18 = vpop.eup %1672  ;;  %1692 = vpow2.f32 %v1094_v36  ;;  %v1102_v5 = vmul.f32 1.442695, %v1003_v26  ;;  %v1004_v38 = vsub.f32 %v2143_v39, %v2354_v51  ;;  %v1005_v62 = vsub.f32 %v2151_v53, %v2354_v51  ;;  %1178 = vadd.xlane.f32.xlu1 %v1177_v2 }
 0x281   : > { %v1675_v8 = vpop.eup %1674  ;;  %1694 = vpow2.f32 %v1096_v29  ;;  %v1006_v12 = vsub.f32 %v2157_v59, %v2354_v51  ;;  %v1007_v50 = vsub.f32 %v2163_v1, %v2354_v51  ;;  %v1181_v11 = vadd.f32 %v1667_v16, %v1180_v58 }
 0x282   : > { %v1677_v30 = vpop.eup %1676  ;;  %1696 = vpow2.f32 %v1098_v42  ;;  %v1104_v19 = vmul.f32 1.442695, %v1004_v38  ;;  %v1106_v40 = vmul.f32 1.442695, %v1005_v62  ;;  %v1185_v36 = vadd.f32 %v1673_v18, %v1671_v15  ;;  %v2682_v15 = vld [vmem:[#allocation27_spill] sm:$0xff]  ;;  %v2683_v18 = vld [vmem:[#allocation29_spill] sm:$0xff] }
 0x283   : > { %v1679_v44 = vpop.eup %1678  ;;  %1698 = vpow2.f32 %v1100_v14  ;;  %v1108_v60 = vmul.f32 1.442695, %v1006_v12  ;;  %v1182_v46 = vadd.f32 %v1669_v45, %v1181_v11  ;;  %v1110_v2 = vmul.f32 1.442695, %v1007_v50 }
 0x284   : > { %v1681_v26 = vpop.eup %1680  ;;  %1700 = vpow2.f32 %v1102_v5  ;;  %v1186_v29 = vadd.f32 %v1675_v8, %v1185_v36  ;;  %v2364_v53 = vpop.xlane.xlu0 %941 }
 0x285   : > { %2681 = vst [vmem:[#allocation44_spill] sm:$0xff] %v2364_v53  ;;  %v1683_v59 = vpop.eup %1682  ;;  %1702 = vpow2.f32 %v1104_v19  ;;  %1183 = vadd.xlane.f32.xlu0 %v1182_v46  ;;  %v1008_v16 = vsub.f32 %v2168_v17, %v2364_v53  ;;  %v1009_v58 = vsub.f32 %v2171_v23, %v2364_v53  ;;  %v1010_v42 = vsub.f32 %v2682_v15, %v2364_v53  ;;  %v2684_v46 = vld [vmem:[#allocation26_spill] sm:$0xff] }
 0x286   : > { %v1685_v14 = vpop.eup %1684  ;;  %1704 = vpow2.f32 %v1106_v40  ;;  %v1187_v45 = vadd.f32 %v1677_v30, %v1186_v29  ;;  %v1011_v5 = vsub.f32 %v2683_v18, %v2364_v53  ;;  %v2374_v38 = vpop.xlane.xlu1 %946  ;;  %v1190_v62 = vadd.f32 %v1681_v26, %v1679_v44  ;;  %v2685_v30 = vld [vmem:[#allocation28_spill] sm:$0xff]  ;;  %v2686_v18 = vld [vmem:[#allocation30_spill] sm:$0xff] }
 0x287   : > { %v1687_v8 = vpop.eup %1686  ;;  %1706 = vpow2.f32 %v1108_v60  ;;  %v1112_v12 = vmul.f32 1.442695, %v1008_v16  ;;  %v1114_v50 = vmul.f32 1.442695, %v1009_v58  ;;  %v1116_v11 = vmul.f32 1.442695, %v1010_v42 }
 0x288   : > { %v1689_v19 = vpop.eup %1688  ;;  %1708 = vpow2.f32 %v1110_v2  ;;  %1188 = vadd.xlane.f32.xlu1 %v1187_v45  ;;  %v1118_v36 = vmul.f32 1.442695, %v1011_v5  ;;  %v1012_v15 = vsub.f32 %v2684_v46, %v2374_v38  ;;  %v1013_v40 = vsub.f32 %v2685_v30, %v2374_v38  ;;  %v2687_v60 = vld [vmem:[#allocation31_spill] sm:$0xff] }
 0x289   : > { %v1691_v29 = vpop.eup %1690  ;;  %1710 = vpow2.f32 %v1112_v12  ;;  %v1014_v44 = vsub.f32 %v2686_v18, %v2374_v38  ;;  %v1015_v26 = vsub.f32 %v2687_v60, %v2374_v38  ;;  %v1191_v16 = vadd.f32 %v1683_v59, %v1190_v62  ;;  %v2689_v59 = vld [vmem:[#allocation32_spill] sm:$0xff] }
 0x28a   : > { %v1693_v58 = vpop.eup %1692  ;;  %1712 = vpow2.f32 %v1114_v50  ;;  %v1120_v2 = vmul.f32 1.442695, %v1012_v15  ;;  %v1122_v42 = vmul.f32 1.442695, %v1013_v40  ;;  %v1195_v45 = vadd.f32 %v1689_v19, %v1687_v8  ;;  %v2690_v15 = vld [vmem:[#allocation33_spill] sm:$0xff]  ;;  %v2691_v8 = vld [vmem:[#allocation35_spill] sm:$0xff] }
 0x28b   : > { %v1695_v5 = vpop.eup %1694  ;;  %1714 = vpow2.f32 %v1116_v11  ;;  %v1124_v46 = vmul.f32 1.442695, %v1014_v44  ;;  %v1192_v23 = vadd.f32 %v1685_v14, %v1191_v16  ;;  %v1126_v30 = vmul.f32 1.442695, %v1015_v26 }
 0x28c   : > { %v1697_v17 = vpop.eup %1696  ;;  %1716 = vpow2.f32 %v1118_v36  ;;  %v1196_v12 = vadd.f32 %v1691_v29, %v1195_v45  ;;  %v2384_v53 = vpop.xlane.xlu0 %951 }
 0x28d   : > { %2688 = vst [vmem:[#allocation31_spill] sm:$0xff] %v2384_v53  ;;  %v1699_v18 = vpop.eup %1698  ;;  %1718 = vpow2.f32 %v1120_v2  ;;  %1193 = vadd.xlane.f32.xlu0 %v1192_v23  ;;  %v1016_v62 = vsub.f32 %v2689_v59, %v2384_v53  ;;  %v1017_v50 = vsub.f32 %v2690_v15, %v2384_v53  ;;  %v1018_v11 = vsub.f32 %v2691_v8, %v2384_v53  ;;  %v2692_v8 = vld [vmem:[#allocation34_spill] sm:$0xff] }
 0x28e   : > { %v1701_v19 = vpop.eup %1700  ;;  %1720 = vpow2.f32 %v1122_v42  ;;  %v1197_v14 = vadd.f32 %v1693_v58, %v1196_v12  ;;  %v1019_v36 = vsub.f32 %v2218_v28, %v2384_v53  ;;  %v2394_v40 = vpop.xlane.xlu1 %956  ;;  %v1200_v29 = vadd.f32 %v1697_v17, %v1695_v5  ;;  %v2693_v58 = vld [vmem:[#allocation36_spill] sm:$0xff]  ;;  %v2694_v28 = vld [vmem:[#allocation38_spill] sm:$0xff] }
 0x28f   : > { %v1703_v44 = vpop.eup %1702  ;;  %1722 = vpow2.f32 %v1124_v46  ;;  %v1128_v23 = vmul.f32 1.442695, %v1016_v62  ;;  %v1130_v26 = vmul.f32 1.442695, %v1017_v50  ;;  %v1132_v16 = vmul.f32 1.442695, %v1018_v11 }
 0x290   : > { %v1705_v2 = vpop.eup %1704  ;;  %1724 = vpow2.f32 %v1126_v30  ;;  %1198 = vadd.xlane.f32.xlu1 %v1197_v14  ;;  %v1134_v45 = vmul.f32 1.442695, %v1019_v36  ;;  %v1020_v15 = vsub.f32 %v2692_v8, %v2394_v40  ;;  %v1021_v42 = vsub.f32 %v2693_v58, %v2394_v40 }
 0x291   : > { %v1707_v12 = vpop.eup %1706  ;;  %1726 = vpow2.f32 %v1128_v23  ;;  %v1022_v17 = vsub.f32 %v2694_v28, %v2394_v40  ;;  %v1023_v46 = vsub.f32 %v2227_v10, %v2394_v40  ;;  %v1201_v5 = vadd.f32 %v1699_v18, %v1200_v29 }
 0x292   : > { %v1709_v62 = vpop.eup %1708  ;;  %1728 = vpow2.f32 %v1130_v26  ;;  %v1136_v30 = vmul.f32 1.442695, %v1020_v15  ;;  %v1138_v50 = vmul.f32 1.442695, %v1021_v42  ;;  %v1205_v11 = vadd.f32 %v1705_v2, %v1703_v44 }
 0x293   : > { %v1711_v14 = vpop.eup %1710  ;;  %1730 = vpow2.f32 %v1132_v16  ;;  %v1140_v36 = vmul.f32 1.442695, %v1022_v17  ;;  %v1202_v8 = vadd.f32 %v1701_v19, %v1201_v5  ;;  %v1142_v58 = vmul.f32 1.442695, %v1023_v46 }
 0x294   : > { %v1713_v59 = vpop.eup %1712  ;;  %1732 = vpow2.f32 %v1134_v45  ;;  %v1206_v23 = vadd.f32 %v1707_v12, %v1205_v11  ;;  %v2404_v53 = vpop.xlane.xlu0 %961 }
 0x295   : > { %v1715_v28 = vpop.eup %1714  ;;  %1734 = vpow2.f32 %v1136_v30  ;;  %1203 = vadd.xlane.f32.xlu0 %v1202_v8  ;;  %v1024_v18 = vsub.f32 %v2232_v25, %v2404_v53  ;;  %v1025_v15 = vsub.f32 %v2235_v52, %v2404_v53  ;;  %v1026_v29 = vsub.f32 %v2242_v41, %v2404_v53 }
 0x296   : > { %v1717_v44 = vpop.eup %1716  ;;  %1736 = vpow2.f32 %v1138_v50  ;;  %v1207_v19 = vadd.f32 %v1709_v62, %v1206_v23  ;;  %v1027_v26 = vsub.f32 %v2250_v22, %v2404_v53  ;;  %v2414_v16 = vpop.xlane.xlu1 %966  ;;  %v1210_v2 = vadd.f32 %v1713_v59, %v1711_v14 }
 0x297   : > { %v1719_v45 = vpop.eup %1718  ;;  %1738 = vpow2.f32 %v1140_v36  ;;  %v1144_v8 = vmul.f32 1.442695, %v1024_v18  ;;  %v1146_v42 = vmul.f32 1.442695, %v1025_v15  ;;  %v1148_v12 = vmul.f32 1.442695, %v1026_v29 }
 0x298   : > { %v1721_v17 = vpop.eup %1720  ;;  %1740 = vpow2.f32 %v1142_v58  ;;  %1208 = vadd.xlane.f32.xlu1 %v1207_v19  ;;  %v1150_v46 = vmul.f32 1.442695, %v1027_v26  ;;  %v1028_v5 = vsub.f32 %v2239_v6, %v2414_v16  ;;  %v1029_v62 = vsub.f32 %v2247_v20, %v2414_v16 }
 0x299   : > { %v1723_v30 = vpop.eup %1722  ;;  %1742 = vpow2.f32 %v1144_v8  ;;  %v1030_v59 = vsub.f32 %v2253_v37, %v2414_v16  ;;  %v1031_v50 = vsub.f32 %v2259_v34, %v2414_v16  ;;  %v1211_v11 = vadd.f32 %v1715_v28, %v1210_v2 }
 0x29a   : > { %v1725_v14 = vpop.eup %1724  ;;  %1744 = vpow2.f32 %v1146_v42  ;;  %v1152_v58 = vmul.f32 1.442695, %v1028_v5  ;;  %v1154_v36 = vmul.f32 1.442695, %v1029_v62  ;;  %v1215_v23 = vadd.f32 %v1721_v17, %v1719_v45 }
 0x29b   : > { %v1727_v18 = vpop.eup %1726  ;;  %1746 = vpow2.f32 %v1148_v12  ;;  %v1212_v15 = vadd.f32 %v1717_v44, %v1211_v11  ;;  %v1156_v19 = vmul.f32 1.442695, %v1030_v59  ;;  %v1158_v34 = vmul.f32 1.442695, %v1031_v50 }
 0x29c   : > { %v1729_v29 = vpop.eup %1728  ;;  %1748 = vpow2.f32 %v1150_v46  ;;  %v1216_v26 = vadd.f32 %v1723_v30, %v1215_v23 }
 0x29d   : > { %v1731_v8 = vpop.eup %1730  ;;  %1750 = vpow2.f32 %v1152_v58  ;;  %1213 = vadd.xlane.f32.xlu0 %v1212_v15  ;;  %v1220_v37 = vadd.f32 %v1729_v29, %v1727_v18 }
 0x29e   : > { %v1733_v20 = vpop.eup %1732  ;;  %1752 = vpow2.f32 %v1154_v36  ;;  %v1217_v28 = vadd.f32 %v1725_v14, %v1216_v26 }
 0x29f   : > { %v1735_v2 = vpop.eup %1734  ;;  %v1221_v42 = vadd.f32 %v1731_v8, %v1220_v37  ;;  %1754 = vpow2.f32 %v1156_v19 }
 0x2a0   : > { %v1737_v5 = vpop.eup %1736  ;;  %1218 = vadd.xlane.f32.xlu1 %v1217_v28  ;;  %1756 = vpow2.f32 %v1158_v34 }
 0x2a1   : > { %v1739_v45 = vpop.eup %1738  ;;  %v1222_v12 = vadd.f32 %v1733_v20, %v1221_v42  ;;  %v1225_v44 = vadd.f32 %v1737_v5, %v1735_v2 }
 0x2a2   : > { %v1741_v17 = vpop.eup %1740 }
 0x2a3   : > { %v1743_v46 = vpop.eup %1742  ;;  %1223 = vadd.xlane.f32.xlu0 %v1222_v12  ;;  %v1226_v62 = vadd.f32 %v1739_v45, %v1225_v44 }
 0x2a4   : > { %v1745_v30 = vpop.eup %1744 }
 0x2a5   : > { %v1747_v59 = vpop.eup %1746  ;;  %v1227_v11 = vadd.f32 %v1741_v17, %v1226_v62  ;;  %v1230_v58 = vadd.f32 %v1745_v30, %v1743_v46  ;;  %v2695_v17 = vld [vmem:[#allocation2_spill] sm:$0xff]  ;;  %v2696_v30 = vld [vmem:[#allocation5_spill] sm:$0xff] }
 0x2a6   : > { %v1749_v36 = vpop.eup %1748 }
 0x2a7   : > { %v1751_v50 = vpop.eup %1750  ;;  %1228 = vadd.xlane.f32.xlu1 %v1227_v11  ;;  %v1231_v14 = vadd.f32 %v1747_v59, %v1230_v58 }
 0x2a8   : > { %v1753_v37 = vpop.eup %1752 }
 0x2a9   : > { %v1232_v23 = vadd.f32 %v1749_v36, %v1231_v14  ;;  %v1235_v18 = vadd.f32 %v1753_v37, %v1751_v50  ;;  %v1755_v15 = vpop.eup %1754  ;;  %v2698_v50 = vld [vmem:[#allocation4_spill] sm:$0xff] }
 0x2aa   : > { %v1757_v29 = vpop.eup %1756 }
 0x2ab   : > { %1233 = vadd.xlane.f32.xlu0 %v1232_v23  ;;  %v1236_v20 = vadd.f32 %v1755_v15, %v1235_v18 }
 0x2ad   : > { %v1237_v34 = vadd.f32 %v1757_v29, %v1236_v20 }
 0x2af   : > { %1238 = vadd.xlane.f32.xlu1 %v1237_v34 }
 0x302   : > { %v1164_v19 = vpop.xlane.xlu0 %1163 }
 0x303   : > { %1758 = vlog2.f32 %v1164_v19 }
 0x305   : > { %v1169_v26 = vpop.xlane.xlu1 %1168 }
 0x306   : > { %1760 = vlog2.f32 %v1169_v26  ;;  %v2701_v26 = vld [vmem:[#allocation10_spill] sm:$0xff] }
 0x30a   : > { %v1174_v8 = vpop.xlane.xlu0 %1173 }
 0x30b   : > { %1762 = vlog2.f32 %v1174_v8 }
 0x30d   : > { %v1759_v28 = vpop.eup %1758  ;;  %v1179_v2 = vpop.xlane.xlu1 %1178 }
 0x30e   : > { %v1241_v42 = vmul.f32 0.6931472, %v1759_v28  ;;  %1764 = vlog2.f32 %v1179_v2  ;;  %v2702_v2 = vld [vmem:[#allocation42_spill] sm:$0xff] }
 0x310   : > { %v1761_v5 = vpop.eup %1760  ;;  %v1272_v45 = vadd.f32 %v1241_v42, %v2264_v31 }
 0x311   : > { %v1243_v12 = vmul.f32 0.6931472, %v1761_v5 }
 0x312   : > { %v1288_v44 = vsub.f32 %v2007_v47, %v1272_v45  ;;  %v1289_v46 = vsub.f32 %v2695_v17, %v1272_v45  ;;  %v1290_v62 = vsub.f32 %v2018_v57, %v1272_v45  ;;  %v1291_v59 = vsub.f32 %v2696_v30, %v1272_v45  ;;  %v1184_v31 = vpop.xlane.xlu0 %1183  ;;  %v2697_v47 = vld [vmem:[#allocation3_spill] sm:$0xff]  ;;  %v2704_v45 = vld [vmem:[#allocation9_spill] sm:$0xff] }
 0x313   : > { %v1273_v11 = vadd.f32 %v1243_v12, %v2274_v35  ;;  %1766 = vlog2.f32 %v1184_v31 }
 0x314   : > { %1352 = vst [vmem:[%s2429_s30] sm:$0xff] %v1288_v44  ;;  %1353 = vst [vmem:[%s2429_s30 + $0x8] sm:$0xff] %v1289_v46  ;;  %v2705_v44 = vld [vmem:[#allocation11_spill] sm:$0xff]  ;;  %v2706_v46 = vld [vmem:[#allocation13_spill] sm:$0xff] }
 0x315   : > { %1354 = vst [vmem:[%s2429_s30 + $0x10] sm:$0xff] %v1290_v62  ;;  %1355 = vst [vmem:[%s2429_s30 + $0x18] sm:$0xff] %v1291_v59  ;;  %v1763_v58 = vpop.eup %1762  ;;  %v1292_v36 = vsub.f32 %v2697_v47, %v1273_v11  ;;  %v1293_v14 = vsub.f32 %v2698_v50, %v1273_v11  ;;  %v1294_v57 = vsub.f32 %v2029_v61, %v1273_v11  ;;  %v1189_v23 = vpop.xlane.xlu1 %1188  ;;  %v2699_v61 = vld [vmem:[#allocation6_spill] sm:$0xff] }
 0x316   : > { %v1295_v37 = vsub.f32 %v2040_v7, %v1273_v11  ;;  %v1245_v18 = vmul.f32 0.6931472, %v1763_v58  ;;  %1768 = vlog2.f32 %v1189_v23  ;;  %v2700_v7 = vld [vmem:[#allocation8_spill] sm:$0xff]  ;;  %v2707_v11 = vld [vmem:[#allocation43_spill] sm:$0xff] }
 0x317   : > { %1356 = vst [vmem:[%s2429_s30 + $0x20] sm:$0xff] %v1292_v36  ;;  %1357 = vst [vmem:[%s2429_s30 + $0x28] sm:$0xff] %v1293_v14  ;;  %v2708_v36 = vld [vmem:[#allocation12_spill] sm:$0xff]  ;;  %v2709_v14 = vld [vmem:[#allocation14_spill] sm:$0xff] }
 0x318   : > { %1358 = vst [vmem:[%s2429_s30 + $0x30] sm:$0xff] %v1294_v57  ;;  %1359 = vst [vmem:[%s2429_s30 + $0x38] sm:$0xff] %v1295_v37  ;;  %v1765_v35 = vpop.eup %1764  ;;  %v1274_v15 = vadd.f32 %v1245_v18, %v2284_v24  ;;  %v2710_v37 = vld [vmem:[#allocation16_spill] sm:$0xff]  ;;  %v2711_v18 = vld [vmem:[#allocation18_spill] sm:$0xff] }
 0x319   : > { %v1247_v20 = vmul.f32 0.6931472, %v1765_v35 }
 0x31a   : > { %v1296_v29 = vsub.f32 %v2037_v4, %v1274_v15  ;;  %v1297_v34 = vsub.f32 %v2699_v61, %v1274_v15  ;;  %v1298_v19 = vsub.f32 %v2700_v7, %v1274_v15  ;;  %v1299_v8 = vsub.f32 %v2701_v26, %v1274_v15  ;;  %v1194_v28 = vpop.xlane.xlu0 %1193  ;;  %v2703_v4 = vld [vmem:[#allocation7_spill] sm:$0xff]  ;;  %v2713_v7 = vld [vmem:[#allocation17_spill] sm:$0xff] }
 0x31b   : > { %v1275_v42 = vadd.f32 %v1247_v20, %v2702_v2  ;;  %1770 = vlog2.f32 %v1194_v28  ;;  %v2712_v61 = vld [vmem:[#allocation15_spill] sm:$0xff] }
 0x31c   : > { %1360 = vst [vmem:[%s2429_s30 + $0x40] sm:$0xff] %v1296_v29  ;;  %1361 = vst [vmem:[%s2429_s30 + $0x48] sm:$0xff] %v1297_v34  ;;  %v2714_v26 = vld [vmem:[#allocation19_spill] sm:$0xff] }
 0x31d   : > { %1362 = vst [vmem:[%s2429_s30 + $0x50] sm:$0xff] %v1298_v19  ;;  %1363 = vst [vmem:[%s2429_s30 + $0x58] sm:$0xff] %v1299_v8  ;;  %v1767_v24 = vpop.eup %1766  ;;  %v1300_v5 = vsub.f32 %v2703_v4, %v1275_v42  ;;  %v1301_v12 = vsub.f32 %v2704_v45, %v1275_v42  ;;  %v1302_v17 = vsub.f32 %v2705_v44, %v1275_v42  ;;  %v1199_v30 = vpop.xlane.xlu1 %1198 }
 0x31e   : > { %v1303_v62 = vsub.f32 %v2706_v46, %v1275_v42  ;;  %v1249_v59 = vmul.f32 0.6931472, %v1767_v24  ;;  %1772 = vlog2.f32 %v1199_v30 }
 0x31f   : > { %1364 = vst [vmem:[%s2429_s30 + $0x60] sm:$0xff] %v1300_v5  ;;  %1365 = vst [vmem:[%s2429_s30 + $0x68] sm:$0xff] %v1301_v12 }
 0x320   : > { %1366 = vst [vmem:[%s2429_s30 + $0x70] sm:$0xff] %v1302_v17  ;;  %1367 = vst [vmem:[%s2429_s30 + $0x78] sm:$0xff] %v1303_v62  ;;  %v1769_v31 = vpop.eup %1768  ;;  %v1276_v58 = vadd.f32 %v1249_v59, %v2707_v11 }
 0x321   : > { %v1251_v47 = vmul.f32 0.6931472, %v1769_v31 }
 0x322   : > { %v1304_v50 = vsub.f32 %v2708_v36, %v1276_v58  ;;  %v1305_v57 = vsub.f32 %v2709_v14, %v1276_v58  ;;  %v1306_v23 = vsub.f32 %v2710_v37, %v1276_v58  ;;  %v1307_v35 = vsub.f32 %v2711_v18, %v1276_v58  ;;  %v1204_v15 = vpop.xlane.xlu0 %1203  ;;  %v2718_v37 = vld [vmem:[#allocation23_spill] sm:$0xff] }
 0x323   : > { %v1277_v20 = vadd.f32 %v1251_v47, %v2314_v43  ;;  %1774 = vlog2.f32 %v1204_v15 }
 0x324   : > { %1368 = vst [vmem:[%s2429_s30 + $0x80] sm:$0xff] %v1304_v50  ;;  %1369 = vst [vmem:[%s2429_s30 + $0x88] sm:$0xff] %v1305_v57  ;;  %v2717_v57 = vld [vmem:[#allocation22_spill] sm:$0xff] }
 0x325   : > { %1370 = vst [vmem:[%s2429_s30 + $0x90] sm:$0xff] %v1306_v23  ;;  %1371 = vst [vmem:[%s2429_s30 + $0x98] sm:$0xff] %v1307_v35  ;;  %v1771_v29 = vpop.eup %1770  ;;  %v1308_v34 = vsub.f32 %v2712_v61, %v1277_v20  ;;  %v1309_v19 = vsub.f32 %v2713_v7, %v1277_v20  ;;  %v1310_v8 = vsub.f32 %v2714_v26, %v1277_v20  ;;  %v1209_v2 = vpop.xlane.xlu1 %1208  ;;  %v2721_v61 = vld [vmem:[#allocation25_spill] sm:$0xff] }
 0x326   : > { %v1311_v28 = vsub.f32 %v2099_v48, %v1277_v20  ;;  %v1253_v42 = vmul.f32 0.6931472, %v1771_v29  ;;  %1776 = vlog2.f32 %v1209_v2  ;;  %v2720_v20 = vld [vmem:[#allocation24_spill] sm:$0xff] }
 0x327   : > { %1372 = vst [vmem:[%s2429_s30 + $0xa0] sm:$0xff] %v1308_v34  ;;  %1373 = vst [vmem:[%s2429_s30 + $0xa8] sm:$0xff] %v1309_v19  ;;  %v2722_v34 = vld [vmem:[#allocation27_spill] sm:$0xff]  ;;  %v2723_v19 = vld [vmem:[#allocation29_spill] sm:$0xff] }
 0x328   : > { %1374 = vst [vmem:[%s2429_s30 + $0xb0] sm:$0xff] %v1310_v8  ;;  %1375 = vst [vmem:[%s2429_s30 + $0xb8] sm:$0xff] %v1311_v28  ;;  %v1773_v43 = vpop.eup %1772  ;;  %v1278_v24 = vadd.f32 %v1253_v42, %v2324_v54 }
 0x329   : > { %v1255_v4 = vmul.f32 0.6931472, %v1773_v43  ;;  %v2724_v43 = vld [vmem:[#allocation26_spill] sm:$0xff] }
 0x32a   : > { %v1312_v5 = vsub.f32 %v2104_v56, %v1278_v24  ;;  %v1313_v45 = vsub.f32 %v2107_v63, %v1278_v24  ;;  %v1314_v48 = vsub.f32 %v2114_v9, %v1278_v24  ;;  %v1315_v12 = vsub.f32 %v2122_v13, %v1278_v24  ;;  %v1214_v44 = vpop.xlane.xlu0 %1213  ;;  %v2715_v63 = vld [vmem:[#allocation20_spill] sm:$0xff]  ;;  %v2716_v9 = vld [vmem:[#allocation21_spill] sm:$0xff] }
 0x32b   : > { %v1279_v17 = vadd.f32 %v1255_v4, %v2334_v0  ;;  %1778 = vlog2.f32 %v1214_v44  ;;  %v2725_v4 = vld [vmem:[#allocation28_spill] sm:$0xff]  ;;  %v2727_v44 = vld [vmem:[#allocation31_spill] sm:$0xff] }
 0x32c   : > { %1376 = vst [vmem:[%s2429_s30 + $0xc0] sm:$0xff] %v1312_v5  ;;  %1377 = vst [vmem:[%s2429_s30 + $0xc8] sm:$0xff] %v1313_v45  ;;  %v2726_v45 = vld [vmem:[#allocation30_spill] sm:$0xff] }
 0x32d   : > { %1378 = vst [vmem:[%s2429_s30 + $0xd0] sm:$0xff] %v1314_v48  ;;  %1379 = vst [vmem:[%s2429_s30 + $0xd8] sm:$0xff] %v1315_v12  ;;  %v1775_v54 = vpop.eup %1774  ;;  %v1316_v56 = vsub.f32 %v2111_v3, %v1279_v17  ;;  %v1317_v46 = vsub.f32 %v2715_v63, %v1279_v17  ;;  %v1318_v62 = vsub.f32 %v2716_v9, %v1279_v17  ;;  %v1219_v30 = vpop.xlane.xlu1 %1218  ;;  %v2729_v63 = vld [vmem:[#allocation33_spill] sm:$0xff]  ;;  %v2730_v9 = vld [vmem:[#allocation35_spill] sm:$0xff] }
 0x32e   : > { %v1319_v13 = vsub.f32 %v2131_v21, %v1279_v17  ;;  %v1257_v59 = vmul.f32 0.6931472, %v1775_v54  ;;  %1780 = vlog2.f32 %v1219_v30  ;;  %v2728_v54 = vld [vmem:[#allocation32_spill] sm:$0xff] }
 0x32f   : > { %1380 = vst [vmem:[%s2429_s30 + $0xe0] sm:$0xff] %v1316_v56  ;;  %1381 = vst [vmem:[%s2429_s30 + $0xe8] sm:$0xff] %v1317_v46 }
 0x330   : > { %1382 = vst [vmem:[%s2429_s30 + $0xf0] sm:$0xff] %v1318_v62  ;;  %1383 = vst [vmem:[%s2429_s30 + $0xf8] sm:$0xff] %v1319_v13  ;;  %v1777_v0 = vpop.eup %1776  ;;  %v1280_v3 = vadd.f32 %v1257_v59, %v2344_v33  ;;  %v1224_v31 = vpop.xlane.xlu0 %1223  ;;  %v2731_v13 = vld [vmem:[#allocation37_spill] sm:$0xff] }
 0x331   : > { %v1259_v11 = vmul.f32 0.6931472, %v1777_v0  ;;  %1782 = vlog2.f32 %v1224_v31  ;;  %v2732_v31 = vld [vmem:[#allocation34_spill] sm:$0xff] }
 0x332   : > { %v1320_v58 = vsub.f32 %v2136_v27, %v1280_v3  ;;  %v1321_v21 = vsub.f32 %v2139_v32, %v1280_v3  ;;  %v1322_v47 = vsub.f32 %v2146_v49, %v1280_v3  ;;  %v1323_v36 = vsub.f32 %v2154_v55, %v1280_v3 }
 0x333   : > { %v1281_v50 = vadd.f32 %v1259_v11, %v2354_v51  ;;  %v2719_v51 = vld [vmem:[#allocation44_spill] sm:$0xff] }
 0x334   : > { %1384 = vst [vmem:[%s2429_s30 + $0x100] sm:$0xff] %v1320_v58  ;;  %1385 = vst [vmem:[%s2429_s30 + $0x108] sm:$0xff] %v1321_v21  ;;  %v1229_v33 = vpop.xlane.xlu1 %1228  ;;  %v2733_v58 = vld [vmem:[#allocation36_spill] sm:$0xff] }
 0x335   : > { %1386 = vst [vmem:[%s2429_s30 + $0x110] sm:$0xff] %v1322_v47  ;;  %1387 = vst [vmem:[%s2429_s30 + $0x118] sm:$0xff] %v1323_v36  ;;  %v1779_v14 = vpop.eup %1778  ;;  %v1324_v27 = vsub.f32 %v2143_v39, %v1281_v50  ;;  %v1325_v32 = vsub.f32 %v2717_v57, %v1281_v50  ;;  %v1326_v23 = vsub.f32 %v2718_v37, %v1281_v50  ;;  %1784 = vlog2.f32 %v1229_v33  ;;  %v2734_v47 = vld [vmem:[#allocation38_spill] sm:$0xff] }
 0x336   : > { %v1327_v49 = vsub.f32 %v2163_v1, %v1281_v50  ;;  %v1261_v18 = vmul.f32 0.6931472, %v1779_v14 }
 0x337   : > { %1388 = vst [vmem:[%s2429_s30 + $0x120] sm:$0xff] %v1324_v27  ;;  %1389 = vst [vmem:[%s2429_s30 + $0x128] sm:$0xff] %v1325_v32 }
 0x338   : > { %1390 = vst [vmem:[%s2429_s30 + $0x130] sm:$0xff] %v1326_v23  ;;  %1391 = vst [vmem:[%s2429_s30 + $0x138] sm:$0xff] %v1327_v49  ;;  %v1781_v55 = vpop.eup %1780  ;;  %v1282_v35 = vadd.f32 %v1261_v18, %v2719_v51  ;;  %v1234_v39 = vpop.xlane.xlu0 %1233  ;;  %v2735_v23 = vld [vmem:[#allocation39_spill] sm:$0xff] }
 0x339   : > { %v1263_v15 = vmul.f32 0.6931472, %v1781_v55  ;;  %1786 = vlog2.f32 %v1234_v39  ;;  %v2737_v55 = vld [vmem:[#allocation41_spill] sm:$0xff] }
 0x33a   : > { %v1328_v29 = vsub.f32 %v2720_v20, %v1282_v35  ;;  %v1329_v1 = vsub.f32 %v2721_v61, %v1282_v35  ;;  %v1330_v7 = vsub.f32 %v2722_v34, %v1282_v35  ;;  %v1331_v26 = vsub.f32 %v2723_v19, %v1282_v35 }
 0x33b   : > { %v1783_v8 = vpop.eup %1782  ;;  %v1283_v28 = vadd.f32 %v1263_v15, %v2374_v38 }
 0x33c   : > { %1392 = vst [vmem:[%s2429_s30 + $0x140] sm:$0xff] %v1328_v29  ;;  %1393 = vst [vmem:[%s2429_s30 + $0x148] sm:$0xff] %v1329_v1  ;;  %v1265_v2 = vmul.f32 0.6931472, %v1783_v8  ;;  %v1239_v42 = vpop.xlane.xlu1 %1238 }
 0x33d   : > { %1394 = vst [vmem:[%s2429_s30 + $0x150] sm:$0xff] %v1330_v7  ;;  %1395 = vst [vmem:[%s2429_s30 + $0x158] sm:$0xff] %v1331_v26  ;;  %v1332_v24 = vsub.f32 %v2724_v43, %v1283_v28  ;;  %v1333_v5 = vsub.f32 %v2725_v4, %v1283_v28  ;;  %v1334_v48 = vsub.f32 %v2726_v45, %v1283_v28  ;;  %1788 = vlog2.f32 %v1239_v42 }
 0x33e   : > { %v1335_v12 = vsub.f32 %v2687_v60, %v1283_v28  ;;  %v1284_v38 = vadd.f32 %v1265_v2, %v2727_v44 }
 0x33f   : > { %1396 = vst [vmem:[%s2429_s30 + $0x160] sm:$0xff] %v1332_v24  ;;  %1397 = vst [vmem:[%s2429_s30 + $0x168] sm:$0xff] %v1333_v5  ;;  %v1785_v17 = vpop.eup %1784 }
 0x340   : > { %1398 = vst [vmem:[%s2429_s30 + $0x170] sm:$0xff] %v1334_v48  ;;  %1399 = vst [vmem:[%s2429_s30 + $0x178] sm:$0xff] %v1335_v12  ;;  %v1336_v56 = vsub.f32 %v2728_v54, %v1284_v38  ;;  %v1337_v46 = vsub.f32 %v2729_v63, %v1284_v38  ;;  %v1338_v62 = vsub.f32 %v2730_v9, %v1284_v38  ;;  %v1267_v60 = vmul.f32 0.6931472, %v1785_v17 }
 0x341   : > { %v1339_v30 = vsub.f32 %v2731_v13, %v1284_v38 }
 0x342   : > { %1400 = vst [vmem:[%s2429_s30 + $0x180] sm:$0xff] %v1336_v56  ;;  %1401 = vst [vmem:[%s2429_s30 + $0x188] sm:$0xff] %v1337_v46  ;;  %v1285_v0 = vadd.f32 %v1267_v60, %v2394_v40 }
 0x343   : > { %1402 = vst [vmem:[%s2429_s30 + $0x190] sm:$0xff] %v1338_v62  ;;  %1403 = vst [vmem:[%s2429_s30 + $0x198] sm:$0xff] %v1339_v30  ;;  %v1787_v59 = vpop.eup %1786 }
 0x344   : > { %v1269_v3 = vmul.f32 0.6931472, %v1787_v59  ;;  %v1340_v11 = vsub.f32 %v2732_v31, %v1285_v0  ;;  %v1341_v21 = vsub.f32 %v2733_v58, %v1285_v0  ;;  %v1342_v36 = vsub.f32 %v2734_v47, %v1285_v0 }
 0x345   : > { %v1343_v50 = vsub.f32 %v2227_v10, %v1285_v0 }
 0x346   : > { %v1286_v33 = vadd.f32 %v1269_v3, %v2404_v53  ;;  %1404 = vst [vmem:[%s2429_s30 + $0x1a0] sm:$0xff] %v1340_v11  ;;  %1405 = vst [vmem:[%s2429_s30 + $0x1a8] sm:$0xff] %v1341_v21 }
 0x347   : > { %1406 = vst [vmem:[%s2429_s30 + $0x1b0] sm:$0xff] %v1342_v36  ;;  %1407 = vst [vmem:[%s2429_s30 + $0x1b8] sm:$0xff] %v1343_v50  ;;  %v1789_v40 = vpop.eup %1788 }
 0x348   : > { %v1344_v14 = vsub.f32 %v2232_v25, %v1286_v33  ;;  %v1345_v27 = vsub.f32 %v2235_v52, %v1286_v33  ;;  %v1346_v57 = vsub.f32 %v2242_v41, %v1286_v33  ;;  %v1347_v32 = vsub.f32 %v2250_v22, %v1286_v33  ;;  %v2736_v25 = vld [vmem:[#allocation40_spill] sm:$0xff] }
 0x349   : > { %v1271_v10 = vmul.f32 0.6931472, %v1789_v40 }
 0x34a   : > { %1408 = vst [vmem:[%s2429_s30 + $0x1c0] sm:$0xff] %v1344_v14  ;;  %1409 = vst [vmem:[%s2429_s30 + $0x1c8] sm:$0xff] %v1345_v27 }
 0x34b   : > { %1410 = vst [vmem:[%s2429_s30 + $0x1d0] sm:$0xff] %v1346_v57  ;;  %1411 = vst [vmem:[%s2429_s30 + $0x1d8] sm:$0xff] %v1347_v32  ;;  %v1287_v53 = vadd.f32 %v1271_v10, %v2414_v16 }
 0x34d   : > { %v1348_v37 = vsub.f32 %v2239_v6, %v1287_v53  ;;  %v1349_v49 = vsub.f32 %v2735_v23, %v1287_v53  ;;  %v1350_v18 = vsub.f32 %v2736_v25, %v1287_v53  ;;  %v1351_v52 = vsub.f32 %v2737_v55, %v1287_v53 }
 0x34f   : > { %1412 = vst [vmem:[%s2429_s30 + $0x1e0] sm:$0xff] %v1348_v37  ;;  %1413 = vst [vmem:[%s2429_s30 + $0x1e8] sm:$0xff] %v1349_v49 }
 0x350   : > { %1414 = vst [vmem:[%s2429_s30 + $0x1f0] sm:$0xff] %v1350_v18  ;;  %1415 = vst [vmem:[%s2429_s30 + $0x1f8] sm:$0xff] %v1351_v52 }
 0x351 PF: > { %s15_s18 = sadd.s32 1, %s1796_s18  }
 0x352   : > { %p12_p4 = scmp.ge.s32.totalorder %s15_s18, 4  }
 0x354   :  { %14 = sbr.rel (!%p12_p4) target bundleno = 1 (0x1), region = 70 }

</bundles_post_ra>
